<compile_context>
chip_gen: v7x
topology: tpu7x:2x2x1
jax: 0.10.0
libtpu: 0.0.40
codegen_flags: <defaults>
</compile_context>

<pallas_src>
import functools
import math

import jax
import jax.numpy as jnp
from jax.experimental import pallas as pl
from jax.experimental.pallas import tpu as pltpu


# ----------------------------- config ---------------------------------------
class Config:
    def __init__(self, hidden_size=32, intermediate_size=64, num_hidden_layers=2,
                 num_attention_heads=4, layer_norm_eps=1e-6):
        self.hidden_size = hidden_size
        self.intermediate_size = intermediate_size
        self.num_hidden_layers = num_hidden_layers
        self.num_attention_heads = num_attention_heads
        self.layer_norm_eps = layer_norm_eps
        self.head_dim = hidden_size // num_attention_heads


# ----------------------------- helpers ---------------------------------------
_GELU_C = math.sqrt(2.0 / math.pi)


def _gelu_tanh(x):
    # gelu(x, approximate='tanh')
    return 0.5 * x * (1.0 + jnp.tanh(_GELU_C * (x + 0.044715 * x * x * x)))


def _layernorm(h, gamma, beta, eps):
    mu = jnp.mean(h, axis=-1, keepdims=True)
    var = jnp.mean((h - mu) ** 2, axis=-1, keepdims=True)
    return (h - mu) * jax.lax.rsqrt(var + eps) * gamma + beta


# ----------------------------- kernel ---------------------------------------
def encoder_layer_kernel(x_ref,
                         ln1_g_ref, ln1_b_ref,
                         wqkv_ref, bqkv_ref,
                         wo_ref, bo_ref,
                         ln2_g_ref, ln2_b_ref,
                         w1_ref, b1_ref,
                         w2_ref, b2_ref,
                         o_ref,
                         q_scr, k_scr, v_scr, x_scr,
                         *, num_heads, head_dim, eps):
    s_idx = pl.program_id(1)
    TS = o_ref.shape[1]
    D = o_ref.shape[2]

    # ---- once per batch element: stash x (f32) and the fused QKV projection
    #      for the full sequence in VMEM scratch (stays resident over s tiles).
    @pl.when(s_idx == 0)
    def _():
        xf = x_ref[0].astype(jnp.float32)                           # (S, D)
        x_scr[...] = xf
        h = _layernorm(xf, ln1_g_ref[0], ln1_b_ref[0], eps)
        qkv = jnp.dot(h.astype(jnp.bfloat16), wqkv_ref[...],
                      preferred_element_type=jnp.float32) + bqkv_ref[0]
        q_scr[...] = qkv[:, 0 * D:1 * D]                            # f32
        k_scr[...] = qkv[:, 1 * D:2 * D].astype(jnp.bfloat16)
        v_scr[...] = qkv[:, 2 * D:3 * D].astype(jnp.bfloat16)

    # ---- per sequence tile -------------------------------------------------
    row0 = pl.multiple_of(s_idx * TS, TS)
    x_tile = x_scr[pl.ds(row0, TS), :]                              # (TS, D) f32
    q_tile = q_scr[pl.ds(row0, TS), :].astype(jnp.bfloat16)         # (TS, D) bf16
    k_all = k_scr[...]                                              # (S, D) bf16
    v_all = v_scr[...]                                              # (S, D) bf16

    scale = float(head_dim) ** -0.5
    contract_last = (((1,), (1,)), ((), ()))                        # q @ k^T, no .T

    attn = jnp.zeros((TS, D), jnp.float32)                          # single accumulator
    for hh in range(num_heads):                                     # static unroll
        sl = slice(hh * head_dim, (hh + 1) * head_dim)
        scores = jax.lax.dot_general(
            q_tile[:, sl], k_all[:, sl], contract_last,
            preferred_element_type=jnp.float32) * scale             # (TS, S) f32
        m = jnp.max(scores, axis=-1, keepdims=True)
        e = jnp.exp(scores - m)
        probs = e * pl.reciprocal(jnp.sum(e, axis=-1, keepdims=True), approx=True)
        ctx = jnp.dot(probs.astype(jnp.bfloat16), v_all[:, sl],
                      preferred_element_type=jnp.float32)           # (TS, hd)
        # accumulate straight into the output projection: no concat, no
        # per-head live outputs.
        attn = attn + jnp.dot(ctx.astype(jnp.bfloat16), wo_ref[hh],
                              preferred_element_type=jnp.float32)   # (TS, D)

    x1 = x_tile + attn + bo_ref[0]                                  # residual 1

    # ---- LayerNorm 2 + MLP -------------------------------------------------
    h2 = _layernorm(x1, ln2_g_ref[0], ln2_b_ref[0], eps)
    f = jnp.dot(h2.astype(jnp.bfloat16), w1_ref[...],
                preferred_element_type=jnp.float32) + b1_ref[0]
    f = _gelu_tanh(f)
    f = jnp.dot(f.astype(jnp.bfloat16), w2_ref[...],
                preferred_element_type=jnp.float32) + b2_ref[0]

    o_ref[0] = (x1 + f).astype(o_ref.dtype)                         # residual 2


# ----------------------------- wrapper ---------------------------------------
def siglip_encoder_layer(x, packed, cfg, *, seq_tile=None):
    B, S, D = x.shape
    H, hd = cfg.num_attention_heads, cfg.head_dim

    if seq_tile is None:
        seq_tile = S
    assert S % seq_tile == 0, "seq_tile must divide the sequence length"
    assert seq_tile % 8 == 0 or seq_tile == S, "seq_tile must be a multiple of 8"

    grid = (B, S // seq_tile)

    def const_spec(a):
        zeros = (0,) * a.ndim
        return pl.BlockSpec(a.shape, lambda b, s, _z=zeros: _z)

    in_specs = [pl.BlockSpec((1, S, D), lambda b, s: (b, 0, 0))] + \
               [const_spec(a) for a in packed]
    out_spec = pl.BlockSpec((1, seq_tile, D), lambda b, s: (b, s, 0))

    # VMEM budget: double-buffered params + x/out blocks + scratch, with margin.
    # Never go below the 32 MiB default so toy shapes behave exactly as default.
    est = 2 * sum(int(a.size) * a.dtype.itemsize for a in packed)
    est += 2 * (S * D + seq_tile * D) * 4
    est += 2 * S * D * 4 + 2 * S * D * 2            # q/x f32 scratch + k/v bf16 scratch
    vmem_limit = int(min(96 * 1024 * 1024, max(32 * 1024 * 1024, 4 * est)))

    kernel = functools.partial(
        encoder_layer_kernel, num_heads=H, head_dim=hd, eps=cfg.layer_norm_eps)

    return pl.pallas_call(
        kernel,
        out_shape=jax.ShapeDtypeStruct((B, S, D), x.dtype),
        grid=grid,
        in_specs=in_specs,
        out_specs=out_spec,
        scratch_shapes=[
            pltpu.VMEM((S, D), jnp.float32),    # q  (f32: dynamic row slices)
            pltpu.VMEM((S, D), jnp.bfloat16),   # k  (read whole, bf16 MXU operand)
            pltpu.VMEM((S, D), jnp.bfloat16),   # v
            pltpu.VMEM((S, D), jnp.float32),    # x  (residual source)
        ],
        input_output_aliases={0: 0},            # reuse hidden-state HBM buffer
        compiler_params=pltpu.CompilerParams(
            dimension_semantics=("parallel", "arbitrary"),
            vmem_limit_bytes=vmem_limit),
    )(x, *packed)


def siglip_encoder(x, packed_layer_params, cfg, *, seq_tile=None):
    h = x
    for packed in packed_layer_params:
        h = siglip_encoder_layer(h, packed, cfg, seq_tile=seq_tile)
    return h


# --------------------------- params ------------------------------------------
def make_layer_params(key, D, I):
    """Canonical f32 parameters (PyTorch-equivalent layout, weights (in,out))."""
    ks = jax.random.split(key, 8)
    s = 0.05
    ln1_g = jnp.ones((D,), jnp.float32)
    ln1_b = jnp.zeros((D,), jnp.float32)
    wq = jax.random.normal(ks[0], (D, D), jnp.float32) * s
    wk = jax.random.normal(ks[1], (D, D), jnp.float32) * s
    wv = jax.random.normal(ks[2], (D, D), jnp.float32) * s
    wo = jax.random.normal(ks[3], (D, D), jnp.float32) * s
    bq = jax.random.normal(ks[4], (D,), jnp.float32) * s
    bk = jnp.zeros((D,), jnp.float32)
    bv = jax.random.normal(ks[5], (D,), jnp.float32) * s
    bo = jnp.zeros((D,), jnp.float32)
    ln2_g = jnp.ones((D,), jnp.float32)
    ln2_b = jnp.zeros((D,), jnp.float32)
    w1 = jax.random.normal(ks[6], (D, I), jnp.float32) * s
    b1 = jnp.zeros((I,), jnp.float32)
    w2 = jax.random.normal(ks[7], (I, D), jnp.float32) * s
    b2 = jnp.zeros((D,), jnp.float32)
    return (ln1_g, ln1_b, wq, bq, wk, bk, wv, bv, wo, bo,
            ln2_g, ln2_b, w1, b1, w2, b2)


def pack_layer_params(p, cfg):
    """Fuse QKV, cast matmul weights to bf16, reshape wo per-head."""
    (ln1_g, ln1_b, wq, bq, wk, bk, wv, bv, wo, bo,
     ln2_g, ln2_b, w1, b1, w2, b2) = p
    D = cfg.hidden_size
    H, hd = cfg.num_attention_heads, cfg.head_dim
    wqkv = jnp.concatenate([wq, wk, wv], axis=1).astype(jnp.bfloat16)   # (D, 3D)
    bqkv = jnp.concatenate([bq, bk, bv])[None, :]                        # (1, 3D) f32
    wo_h = wo.reshape(H, hd, D).astype(jnp.bfloat16)                     # (H, hd, D)
    return (ln1_g[None, :], ln1_b[None, :],
            wqkv, bqkv,
            wo_h, bo[None, :],
            ln2_g[None, :], ln2_b[None, :],
            w1.astype(jnp.bfloat16), b1[None, :],
            w2.astype(jnp.bfloat16), b2[None, :])


# --------------------------- pure-JAX reference -------------------------------
def ref_layer(x, p, cfg):
    (ln1_g, ln1_b, wq, bq, wk, bk, wv, bv, wo, bo,
     ln2_g, ln2_b, w1, b1, w2, b2) = p
    eps = cfg.layer_norm_eps
    H, hd = cfg.num_attention_heads, cfg.head_dim
    B, S, D = x.shape

    def ln(h, g, b):
        mu = jnp.mean(h, -1, keepdims=True)
        var = jnp.mean((h - mu) ** 2, -1, keepdims=True)
        return (h - mu) * jax.lax.rsqrt(var + eps) * g + b

    h = ln(x, ln1_g, ln1_b)
    q = (h @ wq + bq).reshape(B, S, H, hd).transpose(0, 2, 1, 3)
    k = (h @ wk + bk).reshape(B, S, H, hd).transpose(0, 2, 1, 3)
    v = (h @ wv + bv).reshape(B, S, H, hd).transpose(0, 2, 1, 3)
    s = jnp.einsum('bhqd,bhkd->bhqk', q, k) * hd ** (-0.5)
    pmat = jax.nn.softmax(s, axis=-1)
    o = jnp.einsum('bhqk,bhkd->bhqd', pmat, v).transpose(0, 2, 1, 3).reshape(B, S, D)
    x1 = x + (o @ wo + bo)
    h2 = ln(x1, ln2_g, ln2_b)
    f = _gelu_tanh(h2 @ w1 + b1) @ w2 + b2
    return x1 + f


# ------------------------------- main -----------------------------------------
if __name__ == "__main__":
    cfg = Config(hidden_size=32, intermediate_size=64,
                 num_hidden_layers=2, num_attention_heads=4)
    B, S, D, I = 2, 16, cfg.hidden_size, cfg.intermediate_size

    key = jax.random.PRNGKey(0)
    key, xk = jax.random.split(key)
    x = jax.random.normal(xk, (B, S, D), dtype=jnp.float32)

    layer_keys = jax.random.split(key, cfg.num_hidden_layers)
    canon = [make_layer_params(k, D, I) for k in layer_keys]
    packed = [pack_layer_params(p, cfg) for p in canon]

    # Pure-JAX f32 reference first (x's HBM buffer is donated to the first
    # pallas_call through input_output_aliases).
    ref = x
    for p in canon:
        ref = ref_layer(ref, p, cfg)
    ref = jax.block_until_ready(ref)

    # Pallas encoder: grid (B=2, S/TS=2) exercises the resident-K/V seq tiling.
    out = siglip_encoder(x, packed, cfg, seq_tile=8)
    out = jax.block_until_ready(out)

    err = float(jnp.max(jnp.abs(out - ref)))
    # bf16 MXU operands + approx reciprocal -> looser tolerance than pure f32.
    assert err < 5e-2, f"max abs err {err}"
    print("KERNEL_OK")
</pallas_src>

<mosaic_0001>
module attributes {stable_mosaic.version = 11 : i64} {
  func.func @encoder_layer_kernel(%arg0: i32, %arg1: i32, %arg2: memref<1x16x32xf32, #tpu.memory_space<vmem>>, %arg3: memref<1x32xf32, #tpu.memory_space<vmem>>, %arg4: memref<1x32xf32, #tpu.memory_space<vmem>>, %arg5: memref<32x96xbf16, #tpu.memory_space<vmem>>, %arg6: memref<1x96xf32, #tpu.memory_space<vmem>>, %arg7: memref<4x8x32xbf16, #tpu.memory_space<vmem>>, %arg8: memref<1x32xf32, #tpu.memory_space<vmem>>, %arg9: memref<1x32xf32, #tpu.memory_space<vmem>>, %arg10: memref<1x32xf32, #tpu.memory_space<vmem>>, %arg11: memref<32x64xbf16, #tpu.memory_space<vmem>>, %arg12: memref<1x64xf32, #tpu.memory_space<vmem>>, %arg13: memref<64x32xbf16, #tpu.memory_space<vmem>>, %arg14: memref<1x32xf32, #tpu.memory_space<vmem>>, %arg15: memref<1x8x32xf32, #tpu.memory_space<vmem>>, %arg16: memref<16x32xf32, #tpu.memory_space<vmem>>, %arg17: memref<16x32xbf16, #tpu.memory_space<vmem>>, %arg18: memref<16x32xbf16, #tpu.memory_space<vmem>>, %arg19: memref<16x32xf32, #tpu.memory_space<vmem>>) attributes {dimension_semantics = [#tpu.dimension_semantics<parallel>, #tpu.dimension_semantics<arbitrary>], iteration_bounds = array<i64: 2, 2>, scalar_prefetch = 0 : i64, scratch_operands = 4 : i64, tpu.core_type = #tpu.core_type<tc>, window_params = [{transform_indices = @transform_0, window_bounds = array<i64: 1, 16, 32>}, {pipeline_mode = #tpu.pipeline_mode<synchronous>, transform_indices = @transform_1, window_bounds = array<i64: 1, 32>}, {pipeline_mode = #tpu.pipeline_mode<synchronous>, transform_indices = @transform_2, window_bounds = array<i64: 1, 32>}, {pipeline_mode = #tpu.pipeline_mode<synchronous>, transform_indices = @transform_3, window_bounds = array<i64: 32, 96>}, {pipeline_mode = #tpu.pipeline_mode<synchronous>, transform_indices = @transform_4, window_bounds = array<i64: 1, 96>}, {pipeline_mode = #tpu.pipeline_mode<synchronous>, transform_indices = @transform_5, window_bounds = array<i64: 4, 8, 32>}, {pipeline_mode = #tpu.pipeline_mode<synchronous>, transform_indices = @transform_6, window_bounds = array<i64: 1, 32>}, {pipeline_mode = #tpu.pipeline_mode<synchronous>, transform_indices = @transform_7, window_bounds = array<i64: 1, 32>}, {pipeline_mode = #tpu.pipeline_mode<synchronous>, transform_indices = @transform_8, window_bounds = array<i64: 1, 32>}, {pipeline_mode = #tpu.pipeline_mode<synchronous>, transform_indices = @transform_9, window_bounds = array<i64: 32, 64>}, {pipeline_mode = #tpu.pipeline_mode<synchronous>, transform_indices = @transform_10, window_bounds = array<i64: 1, 64>}, {pipeline_mode = #tpu.pipeline_mode<synchronous>, transform_indices = @transform_11, window_bounds = array<i64: 64, 32>}, {pipeline_mode = #tpu.pipeline_mode<synchronous>, transform_indices = @transform_12, window_bounds = array<i64: 1, 32>}, {transform_indices = @transform_13, window_bounds = array<i64: 1, 8, 32>}]} {
    %c0_i32 = arith.constant 0 : i32
    %0 = arith.cmpi eq, %arg1, %c0_i32 : i32
    %1 = arith.extui %0 : i1 to i32
    %c0_i32_0 = arith.constant 0 : i32
    %2 = arith.cmpi ne, %1, %c0_i32_0 : i32
    scf.if %2 {
      %c0_67 = arith.constant 0 : index
      %c0_68 = arith.constant 0 : index
      %c0_69 = arith.constant 0 : index
      %172 = vector.load %arg2[%c0_67, %c0_68, %c0_69] : memref<1x16x32xf32, #tpu.memory_space<vmem>>, vector<1x16x32xf32>
      %173 = vector.shape_cast %172 : vector<1x16x32xf32> to vector<16x32xf32>
      %c0_70 = arith.constant 0 : index
      %c0_71 = arith.constant 0 : index
      %174 = vector.load %arg19[%c0_70, %c0_71] : memref<16x32xf32, #tpu.memory_space<vmem>>, vector<16x32xf32>
      tpu.vector_store %arg19[%c0_70, %c0_71], %173 {strides = array<i32>} : memref<16x32xf32, #tpu.memory_space<vmem>>, vector<16x32xf32>,
      %c0_72 = arith.constant 0 : index
      %c0_73 = arith.constant 0 : index
      %175 = vector.load %arg3[%c0_72, %c0_73] : memref<1x32xf32, #tpu.memory_space<vmem>>, vector<1x32xf32>
      %176 = vector.shape_cast %175 : vector<1x32xf32> to vector<32xf32>
      %c0_74 = arith.constant 0 : index
      %c0_75 = arith.constant 0 : index
      %177 = vector.load %arg4[%c0_74, %c0_75] : memref<1x32xf32, #tpu.memory_space<vmem>>, vector<1x32xf32>
      %178 = vector.shape_cast %177 : vector<1x32xf32> to vector<32xf32>
      %cst_76 = arith.constant dense<0.000000e+00> : vector<16xf32>
      %179 = vector.multi_reduction <add>, %173, %cst_76 [1] : vector<16x32xf32> to vector<16xf32>
      %180 = vector.shape_cast %179 : vector<16xf32> to vector<16x1xf32>
      %cst_77 = arith.constant 3.200000e+01 : f32
      %181 = vector.broadcast %cst_77 : f32 to vector<16x1xf32>
      %182 = arith.divf %180, %181 : vector<16x1xf32>
      %183 = vector.broadcast %182 : vector<16x1xf32> to vector<16x32xf32>
      %184 = arith.subf %173, %183 : vector<16x32xf32>
      %185 = arith.mulf %184, %184 : vector<16x32xf32>
      %cst_78 = arith.constant dense<0.000000e+00> : vector<16xf32>
      %186 = vector.multi_reduction <add>, %185, %cst_78 [1] : vector<16x32xf32> to vector<16xf32>
      %187 = vector.shape_cast %186 : vector<16xf32> to vector<16x1xf32>
      %cst_79 = arith.constant 3.200000e+01 : f32
      %188 = vector.broadcast %cst_79 : f32 to vector<16x1xf32>
      %189 = arith.divf %187, %188 : vector<16x1xf32>
      %190 = vector.broadcast %182 : vector<16x1xf32> to vector<16x32xf32>
      %191 = arith.subf %173, %190 : vector<16x32xf32>
      %cst_80 = arith.constant 9.99999997E-7 : f32
      %192 = vector.broadcast %cst_80 : f32 to vector<16x1xf32>
      %193 = arith.addf %189, %192 : vector<16x1xf32>
      %194 = math.rsqrt %193 : vector<16x1xf32>
      %195 = vector.broadcast %194 : vector<16x1xf32> to vector<16x32xf32>
      %196 = arith.mulf %191, %195 : vector<16x32xf32>
      %197 = vector.shape_cast %176 : vector<32xf32> to vector<1x32xf32>
      %198 = vector.broadcast %197 : vector<1x32xf32> to vector<16x32xf32>
      %199 = arith.mulf %196, %198 : vector<16x32xf32>
      %200 = vector.shape_cast %178 : vector<32xf32> to vector<1x32xf32>
      %201 = vector.broadcast %200 : vector<1x32xf32> to vector<16x32xf32>
      %202 = arith.addf %199, %201 : vector<16x32xf32>
      %203 = arith.truncf %202 : vector<16x32xf32> to vector<16x32xbf16>
      %c0_81 = arith.constant 0 : index
      %c0_82 = arith.constant 0 : index
      %204 = vector.load %arg5[%c0_81, %c0_82] : memref<32x96xbf16, #tpu.memory_space<vmem>>, vector<32x96xbf16>
      %cst_83 = arith.constant dense<0.000000e+00> : vector<16x96xf32>
      %205 = tpu.matmul %203, %204, %cst_83 {dimension_numbers = #tpu.dot_dimension_numbers<[1], [0], [0], [1], [0, 0, 1, 1], [], []>} : vector<16x32xbf16>, vector<32x96xbf16>, vector<16x96xf32> -> vector<16x96xf32>
      %c0_84 = arith.constant 0 : index
      %c0_85 = arith.constant 0 : index
      %206 = vector.load %arg6[%c0_84, %c0_85] : memref<1x96xf32, #tpu.memory_space<vmem>>, vector<1x96xf32>
      %207 = vector.shape_cast %206 : vector<1x96xf32> to vector<96xf32>
      %208 = vector.shape_cast %207 : vector<96xf32> to vector<1x96xf32>
      %209 = vector.broadcast %208 : vector<1x96xf32> to vector<16x96xf32>
      %210 = arith.addf %205, %209 : vector<16x96xf32>
      %211 = vector.extract_strided_slice %210 {offsets = [0, 0], sizes = [16, 32], strides = [1, 1]} : vector<16x96xf32> to vector<16x32xf32>
      %c0_86 = arith.constant 0 : index
      %c0_87 = arith.constant 0 : index
      %212 = vector.load %arg16[%c0_86, %c0_87] : memref<16x32xf32, #tpu.memory_space<vmem>>, vector<16x32xf32>
      tpu.vector_store %arg16[%c0_86, %c0_87], %211 {strides = array<i32>} : memref<16x32xf32, #tpu.memory_space<vmem>>, vector<16x32xf32>,
      %213 = vector.extract_strided_slice %210 {offsets = [0, 32], sizes = [16, 32], strides = [1, 1]} : vector<16x96xf32> to vector<16x32xf32>
      %214 = arith.truncf %213 : vector<16x32xf32> to vector<16x32xbf16>
      %c0_88 = arith.constant 0 : index
      %c0_89 = arith.constant 0 : index
      %215 = vector.load %arg17[%c0_88, %c0_89] : memref<16x32xbf16, #tpu.memory_space<vmem>>, vector<16x32xbf16>
      tpu.vector_store %arg17[%c0_88, %c0_89], %214 {strides = array<i32>} : memref<16x32xbf16, #tpu.memory_space<vmem>>, vector<16x32xbf16>,
      %216 = vector.extract_strided_slice %210 {offsets = [0, 64], sizes = [16, 32], strides = [1, 1]} : vector<16x96xf32> to vector<16x32xf32>
      %217 = arith.truncf %216 : vector<16x32xf32> to vector<16x32xbf16>
      %c0_90 = arith.constant 0 : index
      %c0_91 = arith.constant 0 : index
      %218 = vector.load %arg18[%c0_90, %c0_91] : memref<16x32xbf16, #tpu.memory_space<vmem>>, vector<16x32xbf16>
      tpu.vector_store %arg18[%c0_90, %c0_91], %217 {strides = array<i32>} : memref<16x32xbf16, #tpu.memory_space<vmem>>, vector<16x32xbf16>,
    } else {
    }
    %c8_i32 = arith.constant 8 : i32
    %3 = arith.muli %arg1, %c8_i32 : i32
    %4 = tpu.assume_multiple %3, 8 : i32
    %5 = arith.index_cast %4 : i32 to index
    %c0 = arith.constant 0 : index
    %6 = vector.load %arg19[%5, %c0] : memref<16x32xf32, #tpu.memory_space<vmem>>, vector<8x32xf32>
    %7 = arith.index_cast %4 : i32 to index
    %c0_1 = arith.constant 0 : index
    %8 = vector.load %arg16[%7, %c0_1] : memref<16x32xf32, #tpu.memory_space<vmem>>, vector<8x32xf32>
    %9 = arith.truncf %8 : vector<8x32xf32> to vector<8x32xbf16>
    %c0_2 = arith.constant 0 : index
    %c0_3 = arith.constant 0 : index
    %10 = vector.load %arg17[%c0_2, %c0_3] : memref<16x32xbf16, #tpu.memory_space<vmem>>, vector<16x32xbf16>
    %c0_4 = arith.constant 0 : index
    %c0_5 = arith.constant 0 : index
    %11 = vector.load %arg18[%c0_4, %c0_5] : memref<16x32xbf16, #tpu.memory_space<vmem>>, vector<16x32xbf16>
    %cst = arith.constant 0.000000e+00 : f32
    %12 = vector.broadcast %cst : f32 to vector<8x32xf32>
    %13 = vector.extract_strided_slice %9 {offsets = [0, 0], sizes = [8, 8], strides = [1, 1]} : vector<8x32xbf16> to vector<8x8xbf16>
    %14 = vector.extract_strided_slice %10 {offsets = [0, 0], sizes = [16, 8], strides = [1, 1]} : vector<16x32xbf16> to vector<16x8xbf16>
    %cst_6 = arith.constant dense<0.000000e+00> : vector<8x16xf32>
    %15 = tpu.matmul %13, %14, %cst_6 {dimension_numbers = #tpu.dot_dimension_numbers<[1], [1], [0], [0], [0, 0, 1, 0], [], []>} : vector<8x8xbf16>, vector<16x8xbf16>, vector<8x16xf32> -> vector<8x16xf32>
    %cst_7 = arith.constant 0.353553385 : f32
    %16 = vector.broadcast %cst_7 : f32 to vector<8x16xf32>
    %17 = arith.mulf %15, %16 : vector<8x16xf32>
    %cst_8 = arith.constant dense<0xFF800000> : vector<8xf32>
    %18 = vector.multi_reduction <maximumf>, %17, %cst_8 [1] : vector<8x16xf32> to vector<8xf32>
    %19 = vector.shape_cast %18 : vector<8xf32> to vector<8x1xf32>
    %20 = vector.broadcast %19 : vector<8x1xf32> to vector<8x16xf32>
    %21 = arith.subf %17, %20 : vector<8x16xf32>
    %22 = math.exp %21 : vector<8x16xf32>
    %cst_9 = arith.constant dense<0.000000e+00> : vector<8xf32>
    %23 = vector.multi_reduction <add>, %22, %cst_9 [1] : vector<8x16xf32> to vector<8xf32>
    %24 = vector.shape_cast %23 : vector<8xf32> to vector<8x1xf32>
    %25 = tpu.reciprocal %24 {approx = true} : vector<8x1xf32> -> vector<8x1xf32>
    %26 = vector.broadcast %25 : vector<8x1xf32> to vector<8x16xf32>
    %27 = arith.mulf %22, %26 : vector<8x16xf32>
    %28 = arith.truncf %27 : vector<8x16xf32> to vector<8x16xbf16>
    %29 = vector.extract_strided_slice %11 {offsets = [0, 0], sizes = [16, 8], strides = [1, 1]} : vector<16x32xbf16> to vector<16x8xbf16>
    %cst_10 = arith.constant dense<0.000000e+00> : vector<8x8xf32>
    %30 = tpu.matmul %28, %29, %cst_10 {dimension_numbers = #tpu.dot_dimension_numbers<[1], [0], [0], [1], [0, 0, 1, 1], [], []>} : vector<8x16xbf16>, vector<16x8xbf16>, vector<8x8xf32> -> vector<8x8xf32>
    %31 = arith.truncf %30 : vector<8x8xf32> to vector<8x8xbf16>
    %c0_11 = arith.constant 0 : index
    %c0_12 = arith.constant 0 : index
    %c0_13 = arith.constant 0 : index
    %32 = vector.load %arg7[%c0_11, %c0_12, %c0_13] : memref<4x8x32xbf16, #tpu.memory_space<vmem>>, vector<1x8x32xbf16>
    %33 = vector.shape_cast %32 : vector<1x8x32xbf16> to vector<8x32xbf16>
    %cst_14 = arith.constant dense<0.000000e+00> : vector<8x32xf32>
    %34 = tpu.matmul %31, %33, %cst_14 {dimension_numbers = #tpu.dot_dimension_numbers<[1], [0], [0], [1], [0, 0, 1, 1], [], []>} : vector<8x8xbf16>, vector<8x32xbf16>, vector<8x32xf32> -> vector<8x32xf32>
    %35 = arith.addf %12, %34 : vector<8x32xf32>
    %36 = vector.extract_strided_slice %9 {offsets = [0, 8], sizes = [8, 8], strides = [1, 1]} : vector<8x32xbf16> to vector<8x8xbf16>
    %37 = vector.extract_strided_slice %10 {offsets = [0, 8], sizes = [16, 8], strides = [1, 1]} : vector<16x32xbf16> to vector<16x8xbf16>
    %cst_15 = arith.constant dense<0.000000e+00> : vector<8x16xf32>
    %38 = tpu.matmul %36, %37, %cst_15 {dimension_numbers = #tpu.dot_dimension_numbers<[1], [1], [0], [0], [0, 0, 1, 0], [], []>} : vector<8x8xbf16>, vector<16x8xbf16>, vector<8x16xf32> -> vector<8x16xf32>
    %cst_16 = arith.constant 0.353553385 : f32
    %39 = vector.broadcast %cst_16 : f32 to vector<8x16xf32>
    %40 = arith.mulf %38, %39 : vector<8x16xf32>
    %cst_17 = arith.constant dense<0xFF800000> : vector<8xf32>
    %41 = vector.multi_reduction <maximumf>, %40, %cst_17 [1] : vector<8x16xf32> to vector<8xf32>
    %42 = vector.shape_cast %41 : vector<8xf32> to vector<8x1xf32>
    %43 = vector.broadcast %42 : vector<8x1xf32> to vector<8x16xf32>
    %44 = arith.subf %40, %43 : vector<8x16xf32>
    %45 = math.exp %44 : vector<8x16xf32>
    %cst_18 = arith.constant dense<0.000000e+00> : vector<8xf32>
    %46 = vector.multi_reduction <add>, %45, %cst_18 [1] : vector<8x16xf32> to vector<8xf32>
    %47 = vector.shape_cast %46 : vector<8xf32> to vector<8x1xf32>
    %48 = tpu.reciprocal %47 {approx = true} : vector<8x1xf32> -> vector<8x1xf32>
    %49 = vector.broadcast %48 : vector<8x1xf32> to vector<8x16xf32>
    %50 = arith.mulf %45, %49 : vector<8x16xf32>
    %51 = arith.truncf %50 : vector<8x16xf32> to vector<8x16xbf16>
    %52 = vector.extract_strided_slice %11 {offsets = [0, 8], sizes = [16, 8], strides = [1, 1]} : vector<16x32xbf16> to vector<16x8xbf16>
    %cst_19 = arith.constant dense<0.000000e+00> : vector<8x8xf32>
    %53 = tpu.matmul %51, %52, %cst_19 {dimension_numbers = #tpu.dot_dimension_numbers<[1], [0], [0], [1], [0, 0, 1, 1], [], []>} : vector<8x16xbf16>, vector<16x8xbf16>, vector<8x8xf32> -> vector<8x8xf32>
    %54 = arith.truncf %53 : vector<8x8xf32> to vector<8x8xbf16>
    %c1 = arith.constant 1 : index
    %c0_20 = arith.constant 0 : index
    %c0_21 = arith.constant 0 : index
    %55 = vector.load %arg7[%c1, %c0_20, %c0_21] : memref<4x8x32xbf16, #tpu.memory_space<vmem>>, vector<1x8x32xbf16>
    %56 = vector.shape_cast %55 : vector<1x8x32xbf16> to vector<8x32xbf16>
    %cst_22 = arith.constant dense<0.000000e+00> : vector<8x32xf32>
    %57 = tpu.matmul %54, %56, %cst_22 {dimension_numbers = #tpu.dot_dimension_numbers<[1], [0], [0], [1], [0, 0, 1, 1], [], []>} : vector<8x8xbf16>, vector<8x32xbf16>, vector<8x32xf32> -> vector<8x32xf32>
    %58 = arith.addf %35, %57 : vector<8x32xf32>
    %59 = vector.extract_strided_slice %9 {offsets = [0, 16], sizes = [8, 8], strides = [1, 1]} : vector<8x32xbf16> to vector<8x8xbf16>
    %60 = vector.extract_strided_slice %10 {offsets = [0, 16], sizes = [16, 8], strides = [1, 1]} : vector<16x32xbf16> to vector<16x8xbf16>
    %cst_23 = arith.constant dense<0.000000e+00> : vector<8x16xf32>
    %61 = tpu.matmul %59, %60, %cst_23 {dimension_numbers = #tpu.dot_dimension_numbers<[1], [1], [0], [0], [0, 0, 1, 0], [], []>} : vector<8x8xbf16>, vector<16x8xbf16>, vector<8x16xf32> -> vector<8x16xf32>
    %cst_24 = arith.constant 0.353553385 : f32
    %62 = vector.broadcast %cst_24 : f32 to vector<8x16xf32>
    %63 = arith.mulf %61, %62 : vector<8x16xf32>
    %cst_25 = arith.constant dense<0xFF800000> : vector<8xf32>
    %64 = vector.multi_reduction <maximumf>, %63, %cst_25 [1] : vector<8x16xf32> to vector<8xf32>
    %65 = vector.shape_cast %64 : vector<8xf32> to vector<8x1xf32>
    %66 = vector.broadcast %65 : vector<8x1xf32> to vector<8x16xf32>
    %67 = arith.subf %63, %66 : vector<8x16xf32>
    %68 = math.exp %67 : vector<8x16xf32>
    %cst_26 = arith.constant dense<0.000000e+00> : vector<8xf32>
    %69 = vector.multi_reduction <add>, %68, %cst_26 [1] : vector<8x16xf32> to vector<8xf32>
    %70 = vector.shape_cast %69 : vector<8xf32> to vector<8x1xf32>
    %71 = tpu.reciprocal %70 {approx = true} : vector<8x1xf32> -> vector<8x1xf32>
    %72 = vector.broadcast %71 : vector<8x1xf32> to vector<8x16xf32>
    %73 = arith.mulf %68, %72 : vector<8x16xf32>
    %74 = arith.truncf %73 : vector<8x16xf32> to vector<8x16xbf16>
    %75 = vector.extract_strided_slice %11 {offsets = [0, 16], sizes = [16, 8], strides = [1, 1]} : vector<16x32xbf16> to vector<16x8xbf16>
    %cst_27 = arith.constant dense<0.000000e+00> : vector<8x8xf32>
    %76 = tpu.matmul %74, %75, %cst_27 {dimension_numbers = #tpu.dot_dimension_numbers<[1], [0], [0], [1], [0, 0, 1, 1], [], []>} : vector<8x16xbf16>, vector<16x8xbf16>, vector<8x8xf32> -> vector<8x8xf32>
    %77 = arith.truncf %76 : vector<8x8xf32> to vector<8x8xbf16>
    %c2 = arith.constant 2 : index
    %c0_28 = arith.constant 0 : index
    %c0_29 = arith.constant 0 : index
    %78 = vector.load %arg7[%c2, %c0_28, %c0_29] : memref<4x8x32xbf16, #tpu.memory_space<vmem>>, vector<1x8x32xbf16>
    %79 = vector.shape_cast %78 : vector<1x8x32xbf16> to vector<8x32xbf16>
    %cst_30 = arith.constant dense<0.000000e+00> : vector<8x32xf32>
    %80 = tpu.matmul %77, %79, %cst_30 {dimension_numbers = #tpu.dot_dimension_numbers<[1], [0], [0], [1], [0, 0, 1, 1], [], []>} : vector<8x8xbf16>, vector<8x32xbf16>, vector<8x32xf32> -> vector<8x32xf32>
    %81 = arith.addf %58, %80 : vector<8x32xf32>
    %82 = vector.extract_strided_slice %9 {offsets = [0, 24], sizes = [8, 8], strides = [1, 1]} : vector<8x32xbf16> to vector<8x8xbf16>
    %83 = vector.extract_strided_slice %10 {offsets = [0, 24], sizes = [16, 8], strides = [1, 1]} : vector<16x32xbf16> to vector<16x8xbf16>
    %cst_31 = arith.constant dense<0.000000e+00> : vector<8x16xf32>
    %84 = tpu.matmul %82, %83, %cst_31 {dimension_numbers = #tpu.dot_dimension_numbers<[1], [1], [0], [0], [0, 0, 1, 0], [], []>} : vector<8x8xbf16>, vector<16x8xbf16>, vector<8x16xf32> -> vector<8x16xf32>
    %cst_32 = arith.constant 0.353553385 : f32
    %85 = vector.broadcast %cst_32 : f32 to vector<8x16xf32>
    %86 = arith.mulf %84, %85 : vector<8x16xf32>
    %cst_33 = arith.constant dense<0xFF800000> : vector<8xf32>
    %87 = vector.multi_reduction <maximumf>, %86, %cst_33 [1] : vector<8x16xf32> to vector<8xf32>
    %88 = vector.shape_cast %87 : vector<8xf32> to vector<8x1xf32>
    %89 = vector.broadcast %88 : vector<8x1xf32> to vector<8x16xf32>
    %90 = arith.subf %86, %89 : vector<8x16xf32>
    %91 = math.exp %90 : vector<8x16xf32>
    %cst_34 = arith.constant dense<0.000000e+00> : vector<8xf32>
    %92 = vector.multi_reduction <add>, %91, %cst_34 [1] : vector<8x16xf32> to vector<8xf32>
    %93 = vector.shape_cast %92 : vector<8xf32> to vector<8x1xf32>
    %94 = tpu.reciprocal %93 {approx = true} : vector<8x1xf32> -> vector<8x1xf32>
    %95 = vector.broadcast %94 : vector<8x1xf32> to vector<8x16xf32>
    %96 = arith.mulf %91, %95 : vector<8x16xf32>
    %97 = arith.truncf %96 : vector<8x16xf32> to vector<8x16xbf16>
    %98 = vector.extract_strided_slice %11 {offsets = [0, 24], sizes = [16, 8], strides = [1, 1]} : vector<16x32xbf16> to vector<16x8xbf16>
    %cst_35 = arith.constant dense<0.000000e+00> : vector<8x8xf32>
    %99 = tpu.matmul %97, %98, %cst_35 {dimension_numbers = #tpu.dot_dimension_numbers<[1], [0], [0], [1], [0, 0, 1, 1], [], []>} : vector<8x16xbf16>, vector<16x8xbf16>, vector<8x8xf32> -> vector<8x8xf32>
    %100 = arith.truncf %99 : vector<8x8xf32> to vector<8x8xbf16>
    %c3 = arith.constant 3 : index
    %c0_36 = arith.constant 0 : index
    %c0_37 = arith.constant 0 : index
    %101 = vector.load %arg7[%c3, %c0_36, %c0_37] : memref<4x8x32xbf16, #tpu.memory_space<vmem>>, vector<1x8x32xbf16>
    %102 = vector.shape_cast %101 : vector<1x8x32xbf16> to vector<8x32xbf16>
    %cst_38 = arith.constant dense<0.000000e+00> : vector<8x32xf32>
    %103 = tpu.matmul %100, %102, %cst_38 {dimension_numbers = #tpu.dot_dimension_numbers<[1], [0], [0], [1], [0, 0, 1, 1], [], []>} : vector<8x8xbf16>, vector<8x32xbf16>, vector<8x32xf32> -> vector<8x32xf32>
    %104 = arith.addf %81, %103 : vector<8x32xf32>
    %105 = arith.addf %6, %104 : vector<8x32xf32>
    %c0_39 = arith.constant 0 : index
    %c0_40 = arith.constant 0 : index
    %106 = vector.load %arg8[%c0_39, %c0_40] : memref<1x32xf32, #tpu.memory_space<vmem>>, vector<1x32xf32>
    %107 = vector.shape_cast %106 : vector<1x32xf32> to vector<32xf32>
    %108 = vector.shape_cast %107 : vector<32xf32> to vector<1x32xf32>
    %109 = vector.broadcast %108 : vector<1x32xf32> to vector<8x32xf32>
    %110 = arith.addf %105, %109 : vector<8x32xf32>
    %c0_41 = arith.constant 0 : index
    %c0_42 = arith.constant 0 : index
    %111 = vector.load %arg9[%c0_41, %c0_42] : memref<1x32xf32, #tpu.memory_space<vmem>>, vector<1x32xf32>
    %112 = vector.shape_cast %111 : vector<1x32xf32> to vector<32xf32>
    %c0_43 = arith.constant 0 : index
    %c0_44 = arith.constant 0 : index
    %113 = vector.load %arg10[%c0_43, %c0_44] : memref<1x32xf32, #tpu.memory_space<vmem>>, vector<1x32xf32>
    %114 = vector.shape_cast %113 : vector<1x32xf32> to vector<32xf32>
    %cst_45 = arith.constant dense<0.000000e+00> : vector<8xf32>
    %115 = vector.multi_reduction <add>, %110, %cst_45 [1] : vector<8x32xf32> to vector<8xf32>
    %116 = vector.shape_cast %115 : vector<8xf32> to vector<8x1xf32>
    %cst_46 = arith.constant 3.200000e+01 : f32
    %117 = vector.broadcast %cst_46 : f32 to vector<8x1xf32>
    %118 = arith.divf %116, %117 : vector<8x1xf32>
    %119 = vector.broadcast %118 : vector<8x1xf32> to vector<8x32xf32>
    %120 = arith.subf %110, %119 : vector<8x32xf32>
    %121 = arith.mulf %120, %120 : vector<8x32xf32>
    %cst_47 = arith.constant dense<0.000000e+00> : vector<8xf32>
    %122 = vector.multi_reduction <add>, %121, %cst_47 [1] : vector<8x32xf32> to vector<8xf32>
    %123 = vector.shape_cast %122 : vector<8xf32> to vector<8x1xf32>
    %cst_48 = arith.constant 3.200000e+01 : f32
    %124 = vector.broadcast %cst_48 : f32 to vector<8x1xf32>
    %125 = arith.divf %123, %124 : vector<8x1xf32>
    %126 = vector.broadcast %118 : vector<8x1xf32> to vector<8x32xf32>
    %127 = arith.subf %110, %126 : vector<8x32xf32>
    %cst_49 = arith.constant 9.99999997E-7 : f32
    %128 = vector.broadcast %cst_49 : f32 to vector<8x1xf32>
    %129 = arith.addf %125, %128 : vector<8x1xf32>
    %130 = math.rsqrt %129 : vector<8x1xf32>
    %131 = vector.broadcast %130 : vector<8x1xf32> to vector<8x32xf32>
    %132 = arith.mulf %127, %131 : vector<8x32xf32>
    %133 = vector.shape_cast %112 : vector<32xf32> to vector<1x32xf32>
    %134 = vector.broadcast %133 : vector<1x32xf32> to vector<8x32xf32>
    %135 = arith.mulf %132, %134 : vector<8x32xf32>
    %136 = vector.shape_cast %114 : vector<32xf32> to vector<1x32xf32>
    %137 = vector.broadcast %136 : vector<1x32xf32> to vector<8x32xf32>
    %138 = arith.addf %135, %137 : vector<8x32xf32>
    %139 = arith.truncf %138 : vector<8x32xf32> to vector<8x32xbf16>
    %c0_50 = arith.constant 0 : index
    %c0_51 = arith.constant 0 : index
    %140 = vector.load %arg11[%c0_50, %c0_51] : memref<32x64xbf16, #tpu.memory_space<vmem>>, vector<32x64xbf16>
    %cst_52 = arith.constant dense<0.000000e+00> : vector<8x64xf32>
    %141 = tpu.matmul %139, %140, %cst_52 {dimension_numbers = #tpu.dot_dimension_numbers<[1], [0], [0], [1], [0, 0, 1, 1], [], []>} : vector<8x32xbf16>, vector<32x64xbf16>, vector<8x64xf32> -> vector<8x64xf32>
    %c0_53 = arith.constant 0 : index
    %c0_54 = arith.constant 0 : index
    %142 = vector.load %arg12[%c0_53, %c0_54] : memref<1x64xf32, #tpu.memory_space<vmem>>, vector<1x64xf32>
    %143 = vector.shape_cast %142 : vector<1x64xf32> to vector<64xf32>
    %144 = vector.shape_cast %143 : vector<64xf32> to vector<1x64xf32>
    %145 = vector.broadcast %144 : vector<1x64xf32> to vector<8x64xf32>
    %146 = arith.addf %141, %145 : vector<8x64xf32>
    %cst_55 = arith.constant 5.000000e-01 : f32
    %147 = vector.broadcast %cst_55 : f32 to vector<8x64xf32>
    %148 = arith.mulf %147, %146 : vector<8x64xf32>
    %cst_56 = arith.constant 4.471500e-02 : f32
    %149 = vector.broadcast %cst_56 : f32 to vector<8x64xf32>
    %150 = arith.mulf %149, %146 : vector<8x64xf32>
    %151 = arith.mulf %150, %146 : vector<8x64xf32>
    %152 = arith.mulf %151, %146 : vector<8x64xf32>
    %153 = arith.addf %146, %152 : vector<8x64xf32>
    %cst_57 = arith.constant 0.797884583 : f32
    %154 = vector.broadcast %cst_57 : f32 to vector<8x64xf32>
    %155 = arith.mulf %154, %153 : vector<8x64xf32>
    %156 = math.tanh %155 : vector<8x64xf32>
    %cst_58 = arith.constant 1.000000e+00 : f32
    %157 = vector.broadcast %cst_58 : f32 to vector<8x64xf32>
    %158 = arith.addf %157, %156 : vector<8x64xf32>
    %159 = arith.mulf %148, %158 : vector<8x64xf32>
    %160 = arith.truncf %159 : vector<8x64xf32> to vector<8x64xbf16>
    %c0_59 = arith.constant 0 : index
    %c0_60 = arith.constant 0 : index
    %161 = vector.load %arg13[%c0_59, %c0_60] : memref<64x32xbf16, #tpu.memory_space<vmem>>, vector<64x32xbf16>
    %cst_61 = arith.constant dense<0.000000e+00> : vector<8x32xf32>
    %162 = tpu.matmul %160, %161, %cst_61 {dimension_numbers = #tpu.dot_dimension_numbers<[1], [0], [0], [1], [0, 0, 1, 1], [], []>} : vector<8x64xbf16>, vector<64x32xbf16>, vector<8x32xf32> -> vector<8x32xf32>
    %c0_62 = arith.constant 0 : index
    %c0_63 = arith.constant 0 : index
    %163 = vector.load %arg14[%c0_62, %c0_63] : memref<1x32xf32, #tpu.memory_space<vmem>>, vector<1x32xf32>
    %164 = vector.shape_cast %163 : vector<1x32xf32> to vector<32xf32>
    %165 = vector.shape_cast %164 : vector<32xf32> to vector<1x32xf32>
    %166 = vector.broadcast %165 : vector<1x32xf32> to vector<8x32xf32>
    %167 = arith.addf %162, %166 : vector<8x32xf32>
    %168 = arith.addf %110, %167 : vector<8x32xf32>
    %c0_64 = arith.constant 0 : index
    %c0_65 = arith.constant 0 : index
    %c0_66 = arith.constant 0 : index
    %169 = vector.load %arg15[%c0_64, %c0_65, %c0_66] : memref<1x8x32xf32, #tpu.memory_space<vmem>>, vector<1x8x32xf32>
    %170 = vector.shape_cast %169 : vector<1x8x32xf32> to vector<8x32xf32>
    %171 = vector.shape_cast %168 : vector<8x32xf32> to vector<1x8x32xf32>
    tpu.vector_store %arg15[%c0_64, %c0_65, %c0_66], %171 {strides = array<i32>} : memref<1x8x32xf32, #tpu.memory_space<vmem>>, vector<1x8x32xf32>,
    return
  }
  func.func @transform_0(%arg0: i32, %arg1: i32) -> (i32, i32, i32) {
    %c0_i32 = arith.constant 0 : i32
    %c0_i32_0 = arith.constant 0 : i32
    %c0_i32_1 = arith.constant 0 : i32
    return %arg0, %c0_i32, %c0_i32_0 : i32, i32, i32
  }
  func.func @transform_1(%arg0: i32, %arg1: i32) -> (i32, i32) {
    %c0_i32 = arith.constant 0 : i32
    %c0_i32_0 = arith.constant 0 : i32
    %c0_i32_1 = arith.constant 0 : i32
    return %c0_i32, %c0_i32_0 : i32, i32
  }
  func.func @transform_2(%arg0: i32, %arg1: i32) -> (i32, i32) {
    %c0_i32 = arith.constant 0 : i32
    %c0_i32_0 = arith.constant 0 : i32
    %c0_i32_1 = arith.constant 0 : i32
    return %c0_i32, %c0_i32_0 : i32, i32
  }
  func.func @transform_3(%arg0: i32, %arg1: i32) -> (i32, i32) {
    %c0_i32 = arith.constant 0 : i32
    %c0_i32_0 = arith.constant 0 : i32
    %c0_i32_1 = arith.constant 0 : i32
    return %c0_i32, %c0_i32_0 : i32, i32
  }
  func.func @transform_4(%arg0: i32, %arg1: i32) -> (i32, i32) {
    %c0_i32 = arith.constant 0 : i32
    %c0_i32_0 = arith.constant 0 : i32
    %c0_i32_1 = arith.constant 0 : i32
    return %c0_i32, %c0_i32_0 : i32, i32
  }
  func.func @transform_5(%arg0: i32, %arg1: i32) -> (i32, i32, i32) {
    %c0_i32 = arith.constant 0 : i32
    %c0_i32_0 = arith.constant 0 : i32
    %c0_i32_1 = arith.constant 0 : i32
    %c0_i32_2 = arith.constant 0 : i32
    return %c0_i32, %c0_i32_0, %c0_i32_1 : i32, i32, i32
  }
  func.func @transform_6(%arg0: i32, %arg1: i32) -> (i32, i32) {
    %c0_i32 = arith.constant 0 : i32
    %c0_i32_0 = arith.constant 0 : i32
    %c0_i32_1 = arith.constant 0 : i32
    return %c0_i32, %c0_i32_0 : i32, i32
  }
  func.func @transform_7(%arg0: i32, %arg1: i32) -> (i32, i32) {
    %c0_i32 = arith.constant 0 : i32
    %c0_i32_0 = arith.constant 0 : i32
    %c0_i32_1 = arith.constant 0 : i32
    return %c0_i32, %c0_i32_0 : i32, i32
  }
  func.func @transform_8(%arg0: i32, %arg1: i32) -> (i32, i32) {
    %c0_i32 = arith.constant 0 : i32
    %c0_i32_0 = arith.constant 0 : i32
    %c0_i32_1 = arith.constant 0 : i32
    return %c0_i32, %c0_i32_0 : i32, i32
  }
  func.func @transform_9(%arg0: i32, %arg1: i32) -> (i32, i32) {
    %c0_i32 = arith.constant 0 : i32
    %c0_i32_0 = arith.constant 0 : i32
    %c0_i32_1 = arith.constant 0 : i32
    return %c0_i32, %c0_i32_0 : i32, i32
  }
  func.func @transform_10(%arg0: i32, %arg1: i32) -> (i32, i32) {
    %c0_i32 = arith.constant 0 : i32
    %c0_i32_0 = arith.constant 0 : i32
    %c0_i32_1 = arith.constant 0 : i32
    return %c0_i32, %c0_i32_0 : i32, i32
  }
  func.func @transform_11(%arg0: i32, %arg1: i32) -> (i32, i32) {
    %c0_i32 = arith.constant 0 : i32
    %c0_i32_0 = arith.constant 0 : i32
    %c0_i32_1 = arith.constant 0 : i32
    return %c0_i32, %c0_i32_0 : i32, i32
  }
  func.func @transform_12(%arg0: i32, %arg1: i32) -> (i32, i32) {
    %c0_i32 = arith.constant 0 : i32
    %c0_i32_0 = arith.constant 0 : i32
    %c0_i32_1 = arith.constant 0 : i32
    return %c0_i32, %c0_i32_0 : i32, i32
  }
  func.func @transform_13(%arg0: i32, %arg1: i32) -> (i32, i32, i32) {
    %c0_i32 = arith.constant 0 : i32
    %c0_i32_0 = arith.constant 0 : i32
    return %arg0, %arg1, %c0_i32 : i32, i32, i32
  }
}

</mosaic_0001>

<bundles_post_ra>
// kernel: tpu_custom_call.1
= control target key start
LH: loop header
LB: loop body
LE: loop exit
PB: predicated region body
PF: predicated region fallthrough
CT: control target
= control target key end

     0   :  { %s2539_s0 = inlined_call_operand.hbm [shape: f32[2,16,32], index: 0, kind: input, shape index: {}, may-alias: {0,13}]   ;;  %s2540_s1 = inlined_call_operand.vmem [shape: f32[1,32], index: 1, kind: input, shape index: {}]   ;;  %s2541_s2 = inlined_call_operand.vmem [shape: f32[1,32], index: 2, kind: input, shape index: {}]   ;;  %s2542_s3 = inlined_call_operand.vmem [shape: bf16[32,96], index: 3, kind: input, shape index: {}]   ;;  %s2543_s4 = inlined_call_operand.vmem [shape: f32[1,96], index: 4, kind: input, shape index: {}]   ;;  %s2544_s5 = inlined_call_operand.vmem [shape: bf16[4,8,32], index: 5, kind: input, shape index: {}]   ;;  %s2545_s6 = inlined_call_operand.vmem [shape: f32[1,32], index: 6, kind: input, shape index: {}]   ;;  %s2546_s7 = inlined_call_operand.vmem [shape: f32[1,32], index: 7, kind: input, shape index: {}]   ;;  %s2547_s8 = inlined_call_operand.vmem [shape: f32[1,32], index: 8, kind: input, shape index: {}]   ;;  %s2548_s9 = inlined_call_operand.vmem [shape: bf16[32,64], index: 9, kind: input, shape index: {}]   ;;  %s2549_s10 = inlined_call_operand.vmem [shape: f32[1,64], index: 10, kind: input, shape index: {}]   ;;  %s2550_s11 = inlined_call_operand.vmem [shape: bf16[64,32], index: 11, kind: input, shape index: {}]   ;;  %s2551_s12 = inlined_call_operand.vmem [shape: f32[1,32], index: 12, kind: input, shape index: {}]   ;;  %s2552_s13 = inlined_call_operand.hbm [shape: f32[2,16,32], index: 13, kind: output, shape index: {}, may-alias: {0,13}]  }
   0x1   :  { %2561 = sst [smem:[#allocation17_spill]] %s2539_s0 }
   0x2   :  { %2562 = sst [smem:[#allocation18_spill]] %s2540_s1 }
   0x3   :  { %2563 = sst [smem:[#allocation19_spill]] %s2546_s7 }
   0x4   :  { %2564 = sst [smem:[#allocation20_spill]] %s2547_s8 }
   0x5   :  { %2565 = sst [smem:[#allocation21_spill]] %s2549_s10 }
   0x6   :  { %2566 = sst [smem:[#allocation22_spill]] %s2550_s11 }
   0x7   :  { %2567 = sst [smem:[#allocation23_spill]] %s2551_s12 }
   0x8   :  { %2568 = sst [smem:[#allocation24_spill]] %s2552_s13 }
   0x9   :  { %18 = vsyncpa [#allocation7], 0 }
   0xa   :  { %20 = vsyncpa [#allocation7 + $0x1], 0 }
   0xb   :  { %21 = vsyncpa [#allocation8], 0 }
   0xc   :  { %23 = vsyncpa [#allocation8 + $0x1], 0  ;;  %s2122_s25 = smov 0   ;;  %s2124_s26 = smov 0  }
   0xd   :  { %s2126_s27 = smov 0   ;;  %s2128_s28 = smov 0  }
   0xe   :  { %s2130_s29 = smov 0   ;;  %s2132_s30 = smov 0  }
   0xf   :  { %s2134_s14 = smov 0   ;;  %s2136_s15 = smov 0  }
  0x10   :  { %s2138_s16 = smov 0   ;;  %s2140_s17 = smov 0  }
  0x11   :  { %s2142_s18 = smov 0  }
  0x12 LB: > { %2569 = sst [smem:[#allocation12_spill]] %s2025_s15  ;;  %s1553_s19 = sadd.s32 4294967295, %s2037_s18   ;;  %s2037_s18 = sphi %s2142_s18, %s29_s18   ;;  %s2033_s17 = sphi %s2140_s17, %s2597_s17   ;;  %s2029_s16 = sphi %s2138_s16, %s2604_s16   ;;  %s2025_s15 = sphi %s2136_s15, %s2595_s15   ;;  %s2021_s14 = sphi %s2134_s14, %s2594_s14   ;;  %s2017_s30 = sphi %s2132_s30, %s2603_s30   ;;  %s2013_s29 = sphi %s2130_s29, %s2602_s29   ;;  %s2009_s28 = sphi %s2128_s28, %s2601_s28   ;;  %s2005_s27 = sphi %s2126_s27, %s2600_s27   ;;  %s2001_s26 = sphi %s2124_s26, %s2599_s26   ;;  %s1997_s25 = sphi %s2122_s25, %s2598_s25  }
  0x13   : > { %2570 = sst [smem:[#allocation13_spill]] %s2029_s16  ;;  %s1554_s20 = sadd.s32 4294967294, %s2037_s18  }
  0x14   : > { %2571 = sst [smem:[#allocation14_spill]] %s2033_s17  ;;  %s38_s21 = sadd.s32 1, %s2029_s16 }
  0x15   : > { %s41_s22 = sadd.s32 1, %s2033_s17  ;;  %p39_p0 = scmp.ge.s32.totalorder %s38_s21, 2 }
  0x16   : > { %s48_s23 = sadd.s32 1, %s2017_s30  ;;  %p55_p1 = scmp.ne.s32.totalorder %s2017_s30, %s2013_s29 }
  0x17   : > { %p56_p2 = scmp.eq.s32.totalorder %s2037_s18, 0  ;;  %s2606_s21 = smov (%p39_p0, %s38_s21), 0 }
  0x18   : > { %2572 = sst [smem:[#allocation15_spill]] %s2606_s21  ;;  %s2608_s22 = smov (!%p39_p0, %s41_s22), %s2033_s17 }
  0x19   : > { %p2186_p3 = por %p56_p2, %p55_p1  ;;  %p61_p4 = scmp.ne.s32.totalorder %s2013_s29, %s2009_s28 }
  0x1a   : > { %p43_p5 = scmp.ge.s32.totalorder %s2608_s22, 2  ;;  %p62_p6 = scmp.eq.s32.totalorder %s1553_s19, 0 }
  0x1b   : > { %s324_s13 = ssub.s32 %s2029_s16, %s2606_s21  ;;  %s328_s12 = sadd.s32 1, %s2005_s27 }
  0x1c   : > { %s2610_s22 = smov (%p43_p5, %s2608_s22), 0  ;;  %p2196_p7 = por %p62_p6, %p61_p4 }
  0x1d   : > { %2574 = sst [smem:[#allocation16_spill]] %s2610_s22  ;;  %p338_p8 = scmp.ne.s32.totalorder %s2005_s27, %s2001_s26 }
  0x1e   : > { %s45_s10 = ssub.s32 %s2033_s17, %s2610_s22  ;;  %p339_p9 = scmp.eq.s32.totalorder %s1553_s19, 3 }
  0x1f   : > { %p46_p10 = scmp.eq.s32.totalorder %s45_s10, 0  ;;  %s325_s28 = sor.u32 %s324_s13, %s45_s10 }
  0x20   : > { %p326_p11 = scmp.eq.s32.totalorder %s325_s28, 0  ;;  %p2204_p12 = por %p339_p9, %p338_p8 }
  0x21   : > { %s2209_s16 = scalar_select %p46_p10, %s2017_s30, %s48_s23  }
  0x22   : > { %s2576_s21 = scalar_select %p2204_p12, 1, 0 }
  0x23   : > { %s2212_s11 = scalar_select %p326_p11, %s2005_s27, %s328_s12  }
  0x24   : > { %p344_p13 = scmp.ne.s32.totalorder %s2001_s26, %s1997_s25  ;;  %p345_p0 = scmp.eq.s32.totalorder %s1554_s20, 3 }
  0x25   : > { %p1752_p1 = scmp.lt.s32.totalorder %s2037_s18, 4  ;;  %s401_s19 = sand.u32 1, %s2017_s30  }
  0x26   : > { %p2217_p2 = por %p345_p0, %p344_p13  ;;  %s1557_s10 = sshll.u32 %s401_s19, 4 }
  0x27   : > { %s1604_s13 = sshll.u32 %s2033_s17, 8  ;;  %s2578_s0 = sld [smem:[#allocation17_spill]] }
  0x28   : > { %s2577_s8 = scalar_select %p2217_p2, 1, 0 }
  0x29   : > { %s405_s12 = scalar_lea.vmem [#allocation6], %s1557_s10  ;;  %p2232_p4 = pnand %p1752_p1, %p2186_p3 }
  0x2a   : > { %s412_s23 = sshll.u32 %s405_s12, 4  ;;  %s2237_s17 = scalar_lea.sflag [#allocation7], %s401_s19  ;;  %s2228_s23 = int_to_ptr.vmem [resolvable:$true] %s412_s23 }
  0x2b   : > { %p1887_p8 = pneg %p2232_p4 }
  0x2d   : > { %s2226_s7 = scalar_lea.hbm %s2578_s0, %s1604_s13  ;;  %s1890_s24 = scalar_lea.hbm %s2578_s0, 512 }
  0x2e   : > { %s1885_s22 = scalar_lea.hbm %s2226_s7, 256  ;;  %p1891_p3 = scmp.lt.u32.totalorder %s2226_s7, %s2578_s0 }
  0x2f   : > { %p1886_p6 = scmp.ne.s32.totalorder %s2226_s7, %s1885_s22  ;;  %p1892_p11 = scmp.lt.u32.totalorder %s1890_s24, %s1885_s22 }
  0x30   : > { %p1894_p0 = scmp.lt.u32.totalorder %s1885_s22, %s2226_s7 }
  0x31   : > { %p1888_p9 = pnand %p1887_p8, %p1886_p6  ;;  %p1893_p13 = por %p1892_p11, %p1891_p3 }
  0x33   : > { %p1889_p10 = pneg %p1888_p9  ;;  %p1895_p1 = por %p1894_p0, %p1893_p13 }
  0x35   : > { %p1896_p5 = pnand %p1895_p1, %p1889_p10 }
  0x37   : > { %1899 = shalt.err (!%p1896_p5)
}
  0x38   : > { %s1900_s19 = scalar_lea.vmem %s2228_s23, 256  ;;  %s2039_s10 = smov [#allocation6]  }
  0x39   : > { %p1901_p6 = scmp.ne.s32.totalorder %s2228_s23, %s1900_s19  ;;  %s1905_s13 = sshll.u32 %s2039_s10, 4  ;;  %s1906_s13 = int_to_ptr.vmem [resolvable:$false] %s1905_s13 }
  0x3a   : > { %s1907_s28 = scalar_lea.vmem %s1906_s13, 512  ;;  %p1908_p12 = scmp.lt.s32.totalorder %s2228_s23, %s1906_s13 }
  0x3b   : > { %p1903_p9 = pnand %p1901_p6, %p1887_p8  ;;  %p1909_p3 = scmp.lt.s32.totalorder %s1907_s28, %s1900_s19 }
  0x3d   : > { %p1904_p2 = pneg %p1903_p9  ;;  %p1910_p11 = por %p1909_p3, %p1908_p12 }
  0x3f   : > { %p1911_p13 = pnand %p1910_p11, %p1904_p2 }
  0x41   : > { %1914 = shalt.err (!%p1911_p13)
}
  0x42   : > { %s2040_s22 = smov 128   ;;  %s2041_s24 = smov 8  }
  0x43   : > { %1747 = dma.hbm_to_vmem [thread:$0]  (!%p2232_p4), %s2226_s7, 256, %s2228_s23, %s2237_s17, %s2040_s22, %s2040_s22, %s2041_s24  }
  0x44   : > { %p420_p5 = scmp.lt.s32.totalorder %s2037_s18, 5  ;;  %p2580_p8 = scmp.ge.s32.totalorder %s2037_s18, 1 }
  0x46   : > { %p421_p10 = pnand %p2580_p8, %p420_p5 }
  0x47   : > { %s426_s12 = sand.u32 (!%p421_p10), 1, %s2013_s29  }
  0x48   : > { %424 = sbr.rel (%p421_p10) target bundleno = 4326 (0x10e6), region = 72  ;;  %s1561_s19 = sshll.u32 (!%p421_p10), %s426_s12, 4 }
  0x49   : > { %s427_s10 = scalar_lea.sflag (!%p421_p10), [#allocation7], %s426_s12  ;;  %s430_s13 = scalar_lea.vmem (!%p421_p10), [#allocation6], %s1561_s19 }
  0x4f   : > { %1988 = dma.done.wait (%p2196_p7), %s427_s10, 256  }
  0x50   : > { %1990 = vsyncadd (%p2196_p7), %s427_s10, 4294967040  ;;  %s2560_s28 = sand.u32 1, %s2001_s26   ;;  %p1563_p12 = scmp.ne.s32.totalorder %s2021_s14, 0 }
  0x51   : > { %s2276_s7 = sshll.u32 %s2560_s28, 3  ;;  %v478_v0 = vld [vmem:[%s430_s13] sm:$0xff] (!%p1563_p12)  ;;  %vm480_vm0 = vcmask (!%p1563_p12), 261120   ;;  %v479_v1 = vld [vmem:[%s430_s13 + $0x8] sm:$0xff] (!%p1563_p12)  ;;  %v2042_v15 = vmov (!%p1563_p12), 0.0   ;;  %vm2043_vm1 = vmmov (!%p1563_p12), 0  }
  0x52   : > { %477 = sbr.rel (%p1563_p12) target bundleno = 735 (0x2df), region = 80  ;;  %v485_v2 = vsel (!%p1563_p12), %vm480_vm0, %v478_v0, 0.0  ;;  %481 = vst.msk [vmem:[#allocation5] sm:$0xff] (!%p1563_p12), %vm480_vm0, %v478_v0  ;;  %482 = vst.msk [vmem:[#allocation5 + $0x8] sm:$0xff] (!%p1563_p12), %vm480_vm0, %v479_v1  ;;  %v488_v3 = vsel (!%p1563_p12), %vm480_vm0, %v479_v1, 0.0  ;;  %v1853_v14 = vld [vmem:[%s2542_s3] sm:$0xff] (!%p1563_p12)   ;;  %1640 = vmatprep.subr.bf16.mxu0 (!%p1563_p12), %v2042_v15  ;;  %1644 = vmatprep.mubr.msk.bf16.mxu0 (!%p1563_p12), %vm2043_vm1, %v2042_v15 }
  0x53   : > { %486 = vadd.xlane.f32.xlu0 (!%p1563_p12), %v485_v2  ;;  %1641 = vmatpush3.bf16.msra.mxu0 (!%p1563_p12), %v1853_v14  ;;  %v1854_v16 = vld [vmem:[%s2542_s3 + $0x8] sm:$0xff] (!%p1563_p12)   ;;  %s2581_s1 = sld [smem:[#allocation18_spill]] (!%p1563_p12)  ;;  %v1565_v29 = vld [vmem:[%s2541_s2] ss:$0 sm:$0xff] (!%p1563_p12)  ;;  %s2044_s23 = smov (!%p1563_p12), 64  }
  0x54   : > { %1642 = vmatprep.subr.bf16.mxu0 (!%p1563_p12), %v2042_v15  ;;  %v1566_v34 = vld [vmem:[%s2543_s4] ss:$0 sm:$0xff] (!%p1563_p12)  ;;  %s2045_s20 = smov (!%p1563_p12), 96  }
  0x57   : > { %489 = vadd.xlane.f32.xlu0 (!%p1563_p12), %v488_v3  ;;  %1643 = vmatpush3.bf16.msra.mxu0 (!%p1563_p12), %v1854_v16 }
  0x59   : > { %v1564_v25 = vld [vmem:[%s2581_s1] ss:$0 sm:$0xff] }
  0xe0   : > { %v487_v4 = vpop.xlane.xlu0 %486 }
  0xe1   : > { %v492_v5 = vmul.f32 0.03125, %v487_v4 }
  0xe3   : > { %v494_v6 = vsub.f32 %v478_v0, %v492_v5 }
  0xe4   : > { %v490_v7 = vpop.xlane.xlu0 %489 }
  0xe5   : > { %v493_v8 = vmul.f32 0.03125, %v490_v7  ;;  %v496_v9 = vmul.f32 %v494_v6, %v494_v6 }
  0xe7   : > { %v495_v10 = vsub.f32 %v479_v1, %v493_v8  ;;  %v498_v11 = vsel %vm480_vm0, %v496_v9, 0.0 }
  0xe8   : > { %499 = vadd.xlane.f32.xlu1 %v498_v11 }
  0xe9   : > { %v497_v12 = vmul.f32 %v495_v10, %v495_v10 }
  0xeb   : > { %v501_v13 = vsel %vm480_vm0, %v497_v12, 0.0 }
  0xec   : > { %502 = vadd.xlane.f32.xlu1 %v501_v13 }
 0x175   : > { %v500_v17 = vpop.xlane.xlu1 %499 }
 0x176   : > { %v504_v18 = vmul.f32 0.03125, %v500_v17 }
 0x178   : > { %v506_v19 = vadd.f32 1e-06, %v504_v18 }
 0x179   : > { %v503_v20 = vpop.xlane.xlu1 %502 }
 0x17a   : > { %1855 = vrsqrt.f32 %v506_v19  ;;  %v505_v21 = vmul.f32 0.03125, %v503_v20 }
 0x17c   : > { %v507_v22 = vadd.f32 1e-06, %v505_v21 }
 0x17e   : > { %1857 = vrsqrt.f32 %v507_v22 }
 0x184   : > { %v1856_v23 = vpop.eup %1855 }
 0x185   : > { %v510_v24 = vmul.f32 %v1856_v23, %v494_v6 }
 0x187   : > { %v518_v28 = vmul.f32 %v1564_v25, %v510_v24 }
 0x188   : > { %v1858_v26 = vpop.eup %1857 }
 0x189   : > { %v511_v27 = vmul.f32 %v1858_v26, %v495_v10  ;;  %v526_v31 = vadd.f32 %v1565_v29, %v518_v28 }
 0x18b   : > { %v519_v30 = vmul.f32 %v1564_v25, %v511_v27 }
 0x18d   : > { %v527_v32 = vadd.f32 %v1565_v29, %v519_v30 }
 0x18f   : > { %v528_v33 = vpack.c.bf16 %v527_v32, %v526_v31 }
 0x191   : > { %1645 = vmatmul.mubr.msk.bf16.vlgmr.msra.gmra.mrb[0].mxu0 %vm480_vm0, %v528_v33 }
 0x264   : > { %v589_v35 = vpop.f32.mrb[0].mxu0 }
 0x265   : > { %v590_v36 = vadd.f32 %v1566_v34, %v589_v35  ;;  %v1646_v37 = vpop.f32.mrb[1].mxu0 }
 0x266   : > { %v592_v38 = vpop.f32.mrb[2].mxu0 }
 0x267   : > { %596 = vst.msk [vmem:[#allocation2] sm:$0xff] %vm480_vm0, %v590_v36  ;;  %v593_v39 = vadd.f32 %v1566_v34, %v592_v38  ;;  %v1647_v40 = vpop.f32.mrb[3].mxu0 }
 0x269   : > { %597 = vst.msk [vmem:[#allocation2 + $0x8] sm:$0xff] %vm480_vm0, %v593_v39  ;;  %v598_v41 = vpack.c.bf16 %v593_v39, %v590_v36 }
 0x26b   : > { %604 = vrot.lane.b32.xlu1 %v598_v41, %s2044_s23  ;;  %600 = vrot.lane.b32.xlu0 %v598_v41, %s2045_s20 }
 0x2dd   : > { %v605_v42 = vpop.permute.xlu1 %604  ;;  %v601_v43 = vpop.permute.xlu0 %600 }
 0x2de   : > { %607 = vst.msk [vmem:[#allocation4] sm:$0xff] %vm480_vm0, %v605_v42  ;;  %603 = vst.msk [vmem:[#allocation3] sm:$0xff] %vm480_vm0, %v601_v43 }
 0x2df PF: > { %vm616_vm2 = vcmask 64512   ;;  %s1570_s22 = sshll.u32 %s2021_s14, 3  ;;  %v2046_v45 = vmov 0.0   ;;  %vm2047_vm3 = vmmov 0   ;;  %vm664_vm4 = vcmask 130048   ;;  %s2048_s12 = smov 120  }
 0x2e0   : > { %1648 = vmatprep.subr.bf16.mxu0 %v2046_v45  ;;  %1650 = vmatprep.mubr.msk.bf16.mxu0 %vm2047_vm3, %v2046_v45  ;;  %s611_s24 = scalar_lea.vmem [#allocation2], %s1570_s22  ;;  %v721_v4 = vld [vmem:[%s2544_s5] sm:$0xf]  ;;  %vm840_vm5 = vcmask 1043456   ;;  %s2049_s13 = smov 112   ;;  %vm1259_vm6 = vcmask 261120  }
 0x2e1   : > { %v612_v47 = vld [vmem:[%s611_s24] sm:$0xff]  ;;  %1654 = vmatprep.subr.bf16.mxu1 %v2046_v45  ;;  %1656 = vmatprep.mubr.msk.bf16.mxu1 %vm2047_vm3, %v2046_v45  ;;  %v888_v5 = vsel %vm840_vm5, %v721_v4, 0  ;;  %s2050_s20 = smov 104   ;;  %s2585_s17 = sld [smem:[#allocation21_spill]]  ;;  %vm1404_vm7 = vcmask 523264  }
 0x2e2   : > { %v2320_v48 = vpack.c.bf16 %v612_v47, %v612_v47  ;;  %v1575_v29 = vld [vmem:[%s2544_s5 + $0x4] sm:$0xf]  ;;  %s2588_s23 = scalar_lea.vmem [#allocation9], %s2276_s7  ;;  %s2589_s1 = sld [smem:[#allocation24_spill]] }
 0x2e3   : > { %v842_v32 = vsel %vm840_vm5, %v1575_v29, 0  ;;  %s1466_s28 = sshll.u32 %s2588_s23, 4  ;;  %p2592_p2 = scmp.ne.s32.totalorder %s2576_s21, 0  ;;  %s2474_s28 = int_to_ptr.vmem [resolvable:$true] %s1466_s28 }
 0x2e4   : > { %s1915_s19 = scalar_lea.vmem %s2474_s28, 128  ;;  %s2051_s10 = smov [#allocation9]  }
 0x2e5   : > { %v2306_v44 = vld [vmem:[#allocation3] sm:$0xff]  ;;  %v2332_v60 = vld [vmem:[#allocation4] sm:$0xff]  ;;  %p1916_p7 = scmp.ne.s32.totalorder %s2474_s28, %s1915_s19 }
 0x2e6   : > { %v621_v46 = vsel %vm616_vm2, %v2306_v44, 0  ;;  %726 = vrot.lane.b32.xlu1 %v2306_v44, %s2048_s12  ;;  %1655 = vmatpush3.bf16.msra.mxu1 %v2332_v60 }
 0x2e7   : > { %1649 = vmatpush3.bf16.xpose.msra.mxu0 %v621_v46  ;;  %1660 = vmatprep.subr.bf16.mxu1 %v2046_v45  ;;  %p1917_p4 = pnand %p1916_p7, %p2592_p2 }
 0x2e8   : > { %1678 = vmatprep.subr.bf16.mxu0 %v2046_v45 }
 0x2e9   : > { %p1918_p0 = pneg %p1917_p4 }
 0x2ea   : > { %723 = vrot.lane.b32.xlu1 %v2320_v48, %s2048_s12 }
 0x2ee   : > { %1651 = vmatmul.mubr.msk.bf16.vlgmr.msra.gmra.mrb[0].mxu0 %vm616_vm2, %v2320_v48 }
 0x2ef   : > { %1680 = vmatprep.mubr.msk.bf16.mxu0 %vm2047_vm3, %v2046_v45  ;;  %1679 = vmatpush3.bf16.msra.mxu0 %v888_v5 }
 0x2f0   : > { %1690 = vmatprep.subr.bf16.mxu0 %v2046_v45 }
 0x358   : > { %v727_v63 = vpop.permute.xlu1 %726 }
 0x359   : > { %v732_v1 = vsel %vm616_vm2, %v727_v63, 0 }
 0x35c   : > { %v724_v3 = vpop.permute.xlu1 %723 }
 0x3c1   : > { %v657_v49 = vpop.f32.mrb[0].mxu0 }
 0x3c2   : > { %v663_v50 = vmul.f32 0.35355338, %v657_v49  ;;  %v1652_v51 = vpop.f32.mrb[1].mxu0 }
 0x3c3   : > { %v660_v52 = vpop.f32.mrb[2].mxu0 }
 0x3c4   : > { %v1653_v53 = vpop.f32.mrb[3].mxu0  ;;  %v665_v54 = vsel %vm664_vm4, %v663_v50, -inf }
 0x3c5   : > { %666 = vmax.xlane.f32.xlu0 %v665_v54 }
 0x452   : > { %v667_v55 = vpop.xlane.xlu0 %666 }
 0x453   : > { %v668_v56 = vsub.f32 %v663_v50, %v667_v55 }
 0x455   : > { %v669_v57 = vmul.f32 1.442695, %v668_v56 }
 0x457   : > { %1865 = vpow2.f32 %v669_v57 }
 0x461   : > { %v1866_v58 = vpop.eup %1865 }
 0x462   : > { %v671_v59 = vsel %vm664_vm4, %v1866_v58, 0.0 }
 0x463   : > { %672 = vadd.xlane.f32.xlu0 %v671_v59 }
 0x4f0   : > { %v673_v61 = vpop.xlane.xlu0 %672 }
 0x4f1   : > { %1867 = vrcp.f32 %v673_v61 }
 0x4fb   : > { %v1868_v62 = vpop.eup %1867 }
 0x4fc   : > { %v675_v0 = vmul.f32 %v1868_v62, %v1866_v58 }
 0x4fe   : > { %v676_v2 = vpack.c.bf16 %v675_v0, %v675_v0 }
 0x500   : > { %1657 = vmatmul.mubr.msk.bf16.vlgmr.msra.gmra.mrb[0].mxu1 %vm664_vm4, %v676_v2 }
 0x501   : > { %1661 = vmatpush3.bf16.xpose.msra.mxu1 %v732_v1  ;;  %1662 = vmatprep.mubr.msk.bf16.mxu1 %vm2047_vm3, %v2046_v45 }
 0x502   : > { %1666 = vmatprep.subr.bf16.mxu1 %v2046_v45 }
 0x508   : > { %1663 = vmatmul.mubr.msk.bf16.vlgmr.msra.gmra.mrb[4].mxu1 %vm616_vm2, %v724_v3 }
 0x509   : > { %1668 = vmatprep.mubr.msk.bf16.mxu1 %vm2047_vm3, %v2046_v45 }
 0x5d3   : > { %v714_v6 = vpop.f32.mrb[0].mxu1 }
 0x5d4   : > { %v720_v7 = vpack.c.bf16 %v714_v6, %v714_v6  ;;  %v1658_v8 = vpop.f32.mrb[1].mxu1 }
 0x5d5   : > { %v717_v9 = vpop.f32.mrb[2].mxu1 }
 0x5d6   : > { %v1659_v10 = vpop.f32.mrb[3].mxu1  ;;  %1681 = vmatmul.mubr.msk.bf16.vlgmr.msra.gmra.mrb[4].mxu0 %vm616_vm2, %v720_v7 }
 0x5d7   : > { %1692 = vmatprep.mubr.msk.bf16.mxu0 %vm2047_vm3, %v2046_v45 }
 0x5db   : > { %v768_v11 = vpop.f32.mrb[4].mxu1 }
 0x5dc   : > { %v774_v12 = vmul.f32 0.35355338, %v768_v11  ;;  %v1664_v13 = vpop.f32.mrb[5].mxu1 }
 0x5dd   : > { %v771_v14 = vpop.f32.mrb[6].mxu1 }
 0x5de   : > { %v1665_v15 = vpop.f32.mrb[7].mxu1  ;;  %v775_v16 = vsel %vm664_vm4, %v774_v12, -inf }
 0x5df   : > { %776 = vmax.xlane.f32.xlu0 %v775_v16 }
 0x5f5   : > { %788 = vrot.lane.b32.xlu0 %v2332_v60, %s2048_s12  ;;  %s2584_s12 = sld [smem:[#allocation22_spill]] }
 0x5f9   : > { %932 = vrot.lane.b32.xlu0 %v2306_v44, %s2049_s13 }
 0x5fd   : > { %930 = vrot.lane.b32.xlu0 %v2320_v48, %s2049_s13 }
 0x66c   : > { %v777_v17 = vpop.xlane.xlu0 %776 }
 0x66d   : > { %v778_v18 = vsub.f32 %v774_v12, %v777_v17 }
 0x66f   : > { %v779_v19 = vmul.f32 1.442695, %v778_v18 }
 0x670   : > { %v789_v22 = vpop.permute.xlu0 %788 }
 0x671   : > { %1869 = vpow2.f32 %v779_v19  ;;  %1667 = vmatpush3.bf16.msra.mxu1 %v789_v22  ;;  %v1584_v22 = vld [vmem:[%s2544_s5 + $0xc] sm:$0xf] }
 0x672   : > { %1672 = vmatprep.subr.bf16.mxu1 %v2046_v45 }
 0x674   : > { %v933_v33 = vpop.permute.xlu0 %932 }
 0x675   : > { %v938_v36 = vsel %vm616_vm2, %v933_v33, 0 }
 0x678   : > { %v931_v40 = vpop.permute.xlu0 %930 }
 0x67b   : > { %v1870_v20 = vpop.eup %1869 }
 0x67c   : > { %v781_v21 = vsel %vm664_vm4, %v1870_v20, 0.0 }
 0x67d   : > { %782 = vadd.xlane.f32.xlu1 %v781_v21 }
 0x68e   : > { %993 = vrot.lane.b32.xlu1 %v2332_v60, %s2049_s13  ;;  %s609_s13 = scalar_lea.vmem [#allocation5], %s1570_s22  ;;  %s2583_s22 = sld [smem:[#allocation20_spill]] }
 0x6a9   : > { %v924_v23 = vpop.f32.mrb[4].mxu0 }
 0x6aa   : > { %v1682_v24 = vpop.f32.mrb[5].mxu0 }
 0x6ab   : > { %v927_v25 = vpop.f32.mrb[6].mxu0 }
 0x6ac   : > { %v1683_v26 = vpop.f32.mrb[7].mxu0 }
 0x70a   : > { %v783_v27 = vpop.xlane.xlu1 %782 }
 0x70b   : > { %1871 = vrcp.f32 %v783_v27 }
 0x70e   : > { %v994_v55 = vpop.permute.xlu1 %993 }
 0x70f   : > { %1691 = vmatpush3.bf16.msra.mxu0 %v994_v55  ;;  %v1859_v55 = vld [vmem:[%s2548_s9] sm:$0xff]  }
 0x710   : > { %1702 = vmatprep.subr.bf16.mxu0 %v2046_v45 }
 0x715   : > { %v1872_v28 = vpop.eup %1871 }
 0x716   : > { %v785_v30 = vmul.f32 %v1872_v28, %v1870_v20 }
 0x718   : > { %v786_v31 = vpack.c.bf16 %v785_v30, %v785_v30 }
 0x71a   : > { %1669 = vmatmul.mubr.msk.bf16.vlgmr.msra.gmra.mrb[8].mxu1 %vm664_vm4, %v786_v31 }
 0x71b   : > { %1673 = vmatpush3.bf16.msra.mxu1 %v842_v32  ;;  %1674 = vmatprep.mubr.msk.bf16.mxu1 %vm2047_vm3, %v2046_v45 }
 0x71c   : > { %1684 = vmatprep.subr.bf16.mxu1 %v2046_v45 }
 0x7ed   : > { %v828_v34 = vpop.f32.mrb[8].mxu1 }
 0x7ee   : > { %v834_v35 = vpack.c.bf16 %v828_v34, %v828_v34  ;;  %v1670_v37 = vpop.f32.mrb[9].mxu1 }
 0x7ef   : > { %v831_v38 = vpop.f32.mrb[10].mxu1  ;;  %v610_v37 = vld [vmem:[%s609_s13] sm:$0xff]  ;;  %s2582_s13 = sld [smem:[#allocation19_spill]] }
 0x7f0   : > { %v1671_v39 = vpop.f32.mrb[11].mxu1  ;;  %1675 = vmatmul.mubr.msk.bf16.vlgmr.msra.gmra.mrb[12].mxu1 %vm616_vm2, %v834_v35 }
 0x7f1   : > { %1685 = vmatpush3.bf16.xpose.msra.mxu1 %v938_v36  ;;  %1686 = vmatprep.mubr.msk.bf16.mxu1 %vm2047_vm3, %v2046_v45 }
 0x7f2   : > { %1696 = vmatprep.subr.bf16.mxu1 %v2046_v45 }
 0x7f8   : > { %1687 = vmatmul.mubr.msk.bf16.vlgmr.msra.gmra.mrb[16].mxu1 %vm616_vm2, %v931_v40 }
 0x7f9   : > { %1698 = vmatprep.mubr.msk.bf16.mxu1 %vm2047_vm3, %v2046_v45 }
 0x8c3   : > { %v878_v41 = vpop.f32.mrb[12].mxu1 }
 0x8c4   : > { %v2376_v42 = vadd.f32 %v924_v23, %v878_v41  ;;  %v1676_v43 = vpop.f32.mrb[13].mxu1  ;;  %v1205_v23 = vsel %vm840_vm5, %v1584_v22, 0  ;;  %v1586_v41 = vld [vmem:[%s2545_s6] ss:$0 sm:$0xff] }
 0x8c5   : > { %v881_v46 = vpop.f32.mrb[14].mxu1 }
 0x8c6   : > { %v1677_v47 = vpop.f32.mrb[15].mxu1 }
 0x8cb   : > { %v974_v49 = vpop.f32.mrb[16].mxu1 }
 0x8cc   : > { %v980_v50 = vmul.f32 0.35355338, %v974_v49  ;;  %v1688_v51 = vpop.f32.mrb[17].mxu1 }
 0x8cd   : > { %v977_v52 = vpop.f32.mrb[18].mxu1 }
 0x8ce   : > { %v1689_v53 = vpop.f32.mrb[19].mxu1  ;;  %v981_v54 = vsel %vm664_vm4, %v980_v50, -inf }
 0x8cf   : > { %982 = vmax.xlane.f32.xlu0 %v981_v54 }
 0x95c   : > { %v983_v56 = vpop.xlane.xlu0 %982 }
 0x95d   : > { %v984_v57 = vsub.f32 %v980_v50, %v983_v56  ;;  %v1860_v56 = vld [vmem:[%s2548_s9 + $0x8] sm:$0xff]  }
 0x95f   : > { %v985_v58 = vmul.f32 1.442695, %v984_v57 }
 0x961   : > { %1873 = vpow2.f32 %v985_v58 }
 0x96b   : > { %v1874_v59 = vpop.eup %1873 }
 0x96c   : > { %v987_v61 = vsel %vm664_vm4, %v1874_v59, 0.0 }
 0x96d   : > { %988 = vadd.xlane.f32.xlu1 %v987_v61 }
 0x97e   : > { %1091 = vrot.lane.b32.xlu1 %v2306_v44, %s2050_s20 }
 0x982   : > { %1089 = vrot.lane.b32.xlu1 %v2320_v48, %s2050_s20  ;;  %v1580_v48 = vld [vmem:[%s2544_s5 + $0x8] sm:$0xf] }
 0x983   : > { %v1046_v4 = vsel %vm840_vm5, %v1580_v48, 0  ;;  %v1862_v48 = vld [vmem:[%s2584_s12 + $0x8] sm:$0xff]  }
 0x984   : > { %1697 = vmatpush3.bf16.msra.mxu1 %v1046_v4  ;;  %v1863_v4 = vld [vmem:[%s2584_s12 + $0x10] sm:$0xff]  }
 0x985   : > { %1708 = vmatprep.subr.bf16.mxu1 %v2046_v45 }
 0x9fa   : > { %v989_v62 = vpop.xlane.xlu1 %988 }
 0x9fb   : > { %1875 = vrcp.f32 %v989_v62  ;;  %v1587_v62 = vld [vmem:[%s2582_s13] ss:$0 sm:$0xff]  ;;  %s2587_s13 = sld [smem:[#allocation23_spill]] }
 0x9fe   : > { %v1092_v0 = vpop.permute.xlu1 %1091 }
 0x9ff   : > { %v1097_v2 = vsel %vm616_vm2, %v1092_v0, 0  ;;  %v1588_v0 = vld [vmem:[%s2583_s22] ss:$0 sm:$0xff]  ;;  %s2586_s22 = sld [smem:[#allocation12_spill]] }
 0xa02   : > { %v1090_v44 = vpop.permute.xlu1 %1089 }
 0xa05   : > { %v1876_v63 = vpop.eup %1875 }
 0xa06   : > { %v991_v1 = vmul.f32 %v1876_v63, %v1874_v59 }
 0xa08   : > { %v992_v3 = vpack.c.bf16 %v991_v1, %v991_v1 }
 0xa0a   : > { %1693 = vmatmul.mubr.msk.bf16.vlgmr.msra.gmra.mrb[8].mxu0 %vm664_vm4, %v992_v3 }
 0xa0b   : > { %1703 = vmatpush3.bf16.xpose.msra.mxu0 %v1097_v2  ;;  %1704 = vmatprep.mubr.msk.bf16.mxu0 %vm2047_vm3, %v2046_v45 }
 0xa0c   : > { %1714 = vmatprep.subr.bf16.mxu0 %v2046_v45 }
 0xa12   : > { %1705 = vmatmul.mubr.msk.bf16.vlgmr.msra.gmra.mrb[12].mxu0 %vm616_vm2, %v1090_v44  ;;  %v1861_v44 = vld [vmem:[%s2584_s12] sm:$0xff]  }
 0xa13   : > { %1716 = vmatprep.mubr.msk.bf16.mxu0 %vm2047_vm3, %v2046_v45  ;;  %1715 = vmatpush3.bf16.msra.mxu0 %v1205_v23 }
 0xa14   : > { %1728 = vmatprep.subr.bf16.mxu0 %v2046_v45 }
 0xadd   : > { %v1033_v5 = vpop.f32.mrb[8].mxu0 }
 0xade   : > { %v1039_v6 = vpack.c.bf16 %v1033_v5, %v1033_v5  ;;  %v1694_v7 = vpop.f32.mrb[9].mxu0  ;;  %v1864_v5 = vld [vmem:[%s2584_s12 + $0x18] sm:$0xff]  }
 0xadf   : > { %v1036_v8 = vpop.f32.mrb[10].mxu0 }
 0xae0   : > { %v1695_v9 = vpop.f32.mrb[11].mxu0  ;;  %1699 = vmatmul.mubr.msk.bf16.vlgmr.msra.gmra.mrb[20].mxu1 %vm616_vm2, %v1039_v6  ;;  %v1589_v6 = vld [vmem:[%s2585_s17] ss:$0 sm:$0xff] }
 0xae1   : > { %1710 = vmatprep.mubr.msk.bf16.mxu1 %vm2047_vm3, %v2046_v45 }
 0xae5   : > { %v1133_v10 = vpop.f32.mrb[12].mxu0 }
 0xae6   : > { %v1139_v11 = vmul.f32 0.35355338, %v1133_v10  ;;  %v1706_v12 = vpop.f32.mrb[13].mxu0 }
 0xae7   : > { %v1136_v13 = vpop.f32.mrb[14].mxu0 }
 0xae8   : > { %v1707_v14 = vpop.f32.mrb[15].mxu0  ;;  %v1140_v15 = vsel %vm664_vm4, %v1139_v11, -inf }
 0xae9   : > { %1141 = vmax.xlane.f32.xlu0 %v1140_v15 }
 0xaff   : > { %1152 = vrot.lane.b32.xlu0 %v2332_v60, %s2050_s20  ;;  %s1600_s20 = sshll.u32 %s2586_s22, 1 }
 0xb00   : > { %s1462_s24 = sadd.s32 %s2021_s14, %s1600_s20  ;;  %s2590_s14 = smov %s2588_s23 }
 0xb01   : > { %s1601_s15 = sshll.u32 %s1462_s24, 7  ;;  %s2591_s20 = sand.u32 1, %s2001_s26  }
 0xb02   : > { %s2472_s22 = scalar_lea.hbm %s2589_s1, %s1601_s15  ;;  %s1451_s24 = scalar_lea.sflag [#allocation8], %s2591_s20 }
 0xb76   : > { %v1142_v16 = vpop.xlane.xlu0 %1141 }
 0xb77   : > { %v1143_v17 = vsub.f32 %v1139_v11, %v1142_v16 }
 0xb79   : > { %v1144_v18 = vmul.f32 1.442695, %v1143_v17 }
 0xb7a   : > { %v1153_v21 = vpop.permute.xlu0 %1152 }
 0xb7b   : > { %1877 = vpow2.f32 %v1144_v18  ;;  %1709 = vmatpush3.bf16.msra.mxu1 %v1153_v21  ;;  %v1593_v21 = vld [vmem:[%s2587_s13] ss:$0 sm:$0xff]  ;;  %s1919_s13 = sshll.u32 %s2051_s10, 4  ;;  %s1920_s13 = int_to_ptr.vmem [resolvable:$false] %s1919_s13 }
 0xb7c   : > { %1720 = vmatprep.subr.bf16.mxu1 %v2046_v45  ;;  %s1921_s0 = scalar_lea.vmem %s1920_s13, 256  ;;  %p1922_p1 = scmp.lt.s32.totalorder %s2474_s28, %s1920_s13 }
 0xb7d   : > { %p1923_p6 = scmp.lt.s32.totalorder %s1921_s0, %s1915_s19 }
 0xb7f   : > { %p1924_p9 = por %p1923_p6, %p1922_p1 }
 0xb81   : > { %p1925_p3 = pnand %p1924_p9, %p1918_p0 }
 0xb85   : > { %v1878_v19 = vpop.eup %1877 }
 0xb86   : > { %v1146_v20 = vsel %vm664_vm4, %v1878_v19, 0.0 }
 0xb87   : > { %1147 = vadd.xlane.f32.xlu1 %v1146_v20 }
 0xbb3   : > { %v1082_v60 = vpop.f32.mrb[20].mxu1 }
 0xbb4   : > { %v1088_v24 = vadd.f32 %v1082_v60, %v2376_v42  ;;  %v1700_v25 = vpop.f32.mrb[21].mxu1 }
 0xbb5   : > { %v1085_v26 = vpop.f32.mrb[22].mxu1 }
 0xbb6   : > { %v1701_v27 = vpop.f32.mrb[23].mxu1 }
 0xc14   : > { %v1148_v28 = vpop.xlane.xlu1 %1147 }
 0xc15   : > { %1879 = vrcp.f32 %v1148_v28 }
 0xc1f   : > { %v1880_v29 = vpop.eup %1879 }
 0xc20   : > { %v1150_v30 = vmul.f32 %v1880_v29, %v1878_v19 }
 0xc22   : > { %v1151_v31 = vpack.c.bf16 %v1150_v30, %v1150_v30 }
 0xc24   : > { %1711 = vmatmul.mubr.msk.bf16.vlgmr.msra.gmra.mrb[24].mxu1 %vm664_vm4, %v1151_v31 }
 0xc25   : > { %1724 = vmatprep.mubr.msk.bf16.mxu1 %vm2047_vm3, %v2046_v45  ;;  %1721 = vmatpush3.bf16.msra.mxu1 %v1859_v55 }
 0xc26   : > { %1722 = vmatprep.subr.bf16.mxu1 %v2046_v45 }
 0xc29   : > { %1723 = vmatpush3.bf16.msra.mxu1 %v1860_v56 }
 0xcf7   : > { %v1192_v32 = vpop.f32.mrb[24].mxu1 }
 0xcf8   : > { %v1198_v33 = vpack.c.bf16 %v1192_v32, %v1192_v32  ;;  %v1712_v34 = vpop.f32.mrb[25].mxu1 }
 0xcf9   : > { %v1195_v35 = vpop.f32.mrb[26].mxu1 }
 0xcfa   : > { %v1713_v36 = vpop.f32.mrb[27].mxu1  ;;  %1717 = vmatmul.mubr.msk.bf16.vlgmr.msra.gmra.mrb[16].mxu0 %vm616_vm2, %v1198_v33 }
 0xcfb   : > { %1736 = vmatprep.mubr.msk.bf16.mxu0 %vm2047_vm3, %v2046_v45  ;;  %1729 = vmatpush3.bf16.msra.mxu0 %v1861_v44 }
 0xcfc   : > { %1730 = vmatprep.subr.bf16.mxu0 %v2046_v45 }
 0xcff   : > { %1731 = vmatpush3.bf16.msra.mxu0 %v1862_v48 }
 0xd00   : > { %1732 = vmatprep.subr.bf16.mxu0 %v2046_v45 }
 0xd03   : > { %1733 = vmatpush3.bf16.msra.mxu0 %v1863_v4 }
 0xd04   : > { %1734 = vmatprep.subr.bf16.mxu0 %v2046_v45 }
 0xd07   : > { %1735 = vmatpush3.bf16.msra.mxu0 %v1864_v5 }
 0xdcd   : > { %v1241_v38 = vpop.f32.mrb[16].mxu0 }
 0xdce   : > { %v1247_v39 = vadd.f32 %v1241_v38, %v1088_v24  ;;  %v1718_v40 = vpop.f32.mrb[17].mxu0 }
 0xdcf   : > { %v1244_v42 = vpop.f32.mrb[18].mxu0 }
 0xdd0   : > { %v1248_v43 = vadd.f32 %v1247_v39, %v610_v37  ;;  %v1719_v46 = vpop.f32.mrb[19].mxu0 }
 0xdd2   : > { %v2423_v47 = vadd.f32 %v1586_v41, %v1248_v43 }
 0xdd4   : > { %v1260_v49 = vsel %vm1259_vm6, %v2423_v47, 0.0 }
 0xdd5   : > { %1261 = vadd.xlane.f32.xlu0 %v1260_v49 }
 0xe62   : > { %v1262_v50 = vpop.xlane.xlu0 %1261 }
 0xe63   : > { %v1264_v51 = vmul.f32 0.03125, %v1262_v50 }
 0xe65   : > { %v1265_v52 = vsub.f32 %v2423_v47, %v1264_v51 }
 0xe67   : > { %v1266_v53 = vmul.f32 %v1265_v52, %v1265_v52 }
 0xe69   : > { %v1267_v54 = vsel %vm1259_vm6, %v1266_v53, 0.0 }
 0xe6a   : > { %1268 = vadd.xlane.f32.xlu1 %v1267_v54 }
 0xef7   : > { %v1269_v57 = vpop.xlane.xlu1 %1268 }
 0xef8   : > { %v1270_v58 = vmul.f32 0.03125, %v1269_v57 }
 0xefa   : > { %v1271_v59 = vadd.f32 1e-06, %v1270_v58 }
 0xefc   : > { %1881 = vrsqrt.f32 %v1271_v59 }
 0xf06   : > { %v1882_v61 = vpop.eup %1881 }
 0xf07   : > { %v1273_v63 = vmul.f32 %v1882_v61, %v1265_v52 }
 0xf09   : > { %v1280_v1 = vmul.f32 %v1587_v62, %v1273_v63 }
 0xf0b   : > { %v1287_v2 = vadd.f32 %v1588_v0, %v1280_v1 }
 0xf0d   : > { %v1288_v3 = vpack.c.bf16 %v1287_v2, %v1287_v2 }
 0xf0f   : > { %1725 = vmatmul.mubr.msk.bf16.vlgmr.msra.gmra.mrb[28].mxu1 %vm1259_vm6, %v1288_v3 }
 0xfe2   : > { %v1349_v7 = vpop.f32.mrb[28].mxu1 }
 0xfe3   : > { %v1350_v8 = vadd.f32 %v1589_v6, %v1349_v7  ;;  %v1726_v9 = vpop.f32.mrb[29].mxu1 }
 0xfe4   : > { %v1352_v10 = vpop.f32.mrb[30].mxu1 }
 0xfe5   : > { %v1356_v11 = vmul.f32 0.044715, %v1350_v8  ;;  %v1727_v12 = vpop.f32.mrb[31].mxu1  ;;  %v1355_v17 = vmul.f32 0.5, %v1350_v8 }
 0xfe7   : > { %v1357_v13 = vmul.f32 %v1356_v11, %v1350_v8 }
 0xfe9   : > { %v1358_v14 = vmul.f32 %v1357_v13, %v1350_v8 }
 0xfeb   : > { %v1359_v15 = vadd.f32 %v1358_v14, %v1350_v8 }
 0xfed   : > { %v1360_v16 = vmul.f32 0.7978846, %v1359_v15 }
 0xfef   : > { %1883 = vtanh.f32 %v1360_v16 }
 0xff9   : > { %v1884_v45 = vpop.eup %1883 }
 0xffa   : > { %v1362_v18 = vadd.f32 1.0, %v1884_v45 }
 0xffc   : > { %v1363_v19 = vmul.f32 %v1362_v18, %v1355_v17 }
 0xffe   : > { %v1364_v20 = vpack.c.bf16 %v1363_v19, %v1363_v19 }
0x1000   : > { %1737 = vmatmul.mubr.msk.bf16.vlgmr.msra.gmra.mrb[20].mxu0 %vm1404_vm7, %v1364_v20 }
0x10d3   : > { %v1442_v22 = vpop.f32.mrb[20].mxu0 }
0x10d4   : > { %v1443_v23 = vadd.f32 %v1593_v21, %v1442_v22  ;;  %v1738_v60 = vpop.f32.mrb[21].mxu0 }
0x10d5   : > { %v1445_v24 = vpop.f32.mrb[22].mxu0 }
0x10d6   : > { %v1448_v25 = vadd.f32 %v1443_v23, %v2423_v47  ;;  %v1739_v26 = vpop.f32.mrb[23].mxu0 }
0x10d8   : > { %1449 = vst.msk [vmem:[%s2590_s14] sm:$0xff] %vm1259_vm6, %v1448_v25 }
0x10d9   : > { %1928 = shalt.err (!%p1925_p3)
}
0x10da   : > { %s1929_s7 = scalar_lea.hbm %s2472_s22, 128  ;;  %s1933_s17 = scalar_lea.hbm %s2589_s1, 512 }
0x10db   : > { %p1930_p11 = scmp.ne.s32.totalorder %s2472_s22, %s1929_s7  ;;  %p1934_p8 = scmp.lt.u32.totalorder %s2472_s22, %s2589_s1 }
0x10dc   : > { %p1935_p10 = scmp.lt.u32.totalorder %s1933_s17, %s1929_s7  ;;  %p1937_p7 = scmp.lt.u32.totalorder %s1929_s7, %s2472_s22 }
0x10dd   : > { %p1931_p13 = pnand %p1930_p11, %p2592_p2 }
0x10de   : > { %p1936_p12 = por %p1935_p10, %p1934_p8 }
0x10df   : > { %p1932_p5 = pneg %p1931_p13 }
0x10e0   : > { %p1938_p4 = por %p1937_p7, %p1936_p12 }
0x10e2   : > { %p1939_p0 = pnand %p1938_p4, %p1932_p5 }
0x10e4   : > { %1942 = shalt.err (!%p1939_p0)
}
0x10e5   : > { %1742 = dma.vmem_to_hbm [thread:$0]  (%p2592_p2), %s2474_s28, 128, %s2472_s22, %s1451_s24  }
0x10e6 PF: > { %p1753_p1 = scmp.ge.s32.totalorder %s2037_s18, 2  ;;  %s1478_s19 = sand.u32 1, %s1997_s25  }
0x10e7   : > { %p2593_p6 = scmp.ne.s32.totalorder %s2577_s8, 0  ;;  %s1479_s10 = scalar_lea.sflag [#allocation8], %s1478_s19 }
0x10e9   : > { %p1749_p9 = pnand %p1753_p1, %p2593_p6 }
0x10eb   : > { %1992 = dma.done.wait (!%p1749_p9), %s1479_s10, 128  }
0x10ec   : > { %1994 = vsyncadd (!%p1749_p9), %s1479_s10, 4294967168  ;;  %s29_s18 = sadd.s32 1, %s2037_s18   ;;  %s2594_s14 = sld [smem:[#allocation13_spill]] }
0x10ed   : > { %p26_p3 = scmp.ge.s32.totalorder %s29_s18, 6   ;;  %s2595_s15 = sld [smem:[#allocation14_spill]] }
0x10ee   : > { %s2596_s21 = sld [smem:[#allocation15_spill]]  ;;  %s2597_s17 = sld [smem:[#allocation16_spill]] }
0x10ef   : > { %s2598_s25 = smov %s2001_s26  ;;  %s2599_s26 = smov %s2005_s27 }
0x10f0   : > { %s2600_s27 = smov %s2212_s11  ;;  %s2601_s28 = smov %s2013_s29 }
0x10f1   : > { %s2602_s29 = smov %s2017_s30  ;;  %s2603_s30 = smov %s2209_s16 }
0x10f2   :  { %28 = sbr.rel (!%p26_p3) target bundleno = 18 (0x12), region = 126 }
0x10f4   : > { %s2604_s16 = smov %s2596_s21 }
0x10f9   :  { %1484 = vsyncpa [#allocation7], 1 }
0x10fa   :  { %1486 = vsyncpa [#allocation7 + $0x1], 1 }
0x10fb   :  { %1487 = vsyncpa [#allocation8], 1 }
0x10fc   :  { %1489 = vsyncpa [#allocation8 + $0x1], 1 }

</bundles_post_ra>
